<compile_context>
chip_gen: v6e
topology: v6e:2x2x1
jax: 0.10.0
libtpu: 0.0.40
codegen_flags: <defaults>
</compile_context>

<pallas_src>
import functools
import math

import jax
import jax.numpy as jnp
from jax.experimental import pallas as pl
from jax.experimental.pallas import tpu as pltpu


# ----------------------------------------------------------------------------
# Static slot -> (im2col tap, output segment) schedule for the packed
# multi-scale conv.  Slot 0 = conv1 (tap (2,2)); slots 1..9 = conv3 (taps
# (1..3, 1..3)); slots 10..34 = conv5 (all 25 taps).
# ----------------------------------------------------------------------------
_TAP = ([12]
        + [(dy + 1) * 5 + (dx + 1) for dy in range(3) for dx in range(3)]
        + list(range(25)))
_SEG = [0] + [1] * 9 + [2] * 25
_FIRST = [1] + [1] + [0] * 8 + [1] + [0] * 24
_LAST = [1] + [0] * 8 + [1] + [0] * 24 + [1]
N_SLOTS = len(_TAP)                                   # 35

TAP_IDX = jnp.asarray(_TAP, jnp.int32)
SEG_IDX = jnp.asarray(_SEG, jnp.int32)
FIRST_IDX = jnp.asarray(_FIRST, jnp.int32)
LAST_IDX = jnp.asarray(_LAST, jnp.int32)


def _vmem_limit(est_bytes):
    """Right-sized VMEM request: 1.6x the estimated buffer footprint + 2 MiB,
    clamped to [8 MiB, 48 MiB] so v7x (64 MiB/TC) keeps headroom."""
    return int(max(8 << 20, min(int(est_bytes * 1.6) + (2 << 20), 48 << 20)))


# ----------------------------------------------------------------------------
# Kernel 1: packed multi-scale conv (conv1 / conv3 / conv5, zero taps skipped)
#           + SE squeeze (per-batch spatial mean of each segment).
# grid = (35 nonzero slots,); the fused output block of the current segment is
# resident and accumulated across that segment's taps.
# ----------------------------------------------------------------------------
def conv_ms_kernel(tap_ref, seg_ref, first_ref, last_ref,
                   p_ref, w_ref, b_ref, fused_ref, s_ref, *, B, HW):
    g = pl.program_id(0)

    @pl.when(first_ref[g] == 1)                        # first tap of a segment
    def _():
        fused_ref[...] = jnp.broadcast_to(b_ref[...], fused_ref.shape)

    # bf16 x bf16 -> f32 accumulate on the MXU.
    fused_ref[0] += jnp.dot(p_ref[0], w_ref[0],
                            preferred_element_type=jnp.float32)

    @pl.when(last_ref[g] == 1)                         # last tap of a segment
    def _():
        c = fused_ref.shape[2]
        s_ref[0] = jnp.mean(fused_ref[0].reshape(B, HW, c), axis=1)


# ----------------------------------------------------------------------------
# Kernel 2: fused SE excitation MLP:  y = sigmoid(relu(s @ W1) @ W2)
# (bias=False per the PyTorch module).  Everything fits VMEM; single call.
# ----------------------------------------------------------------------------
def se_kernel(s_ref, w1_ref, w2_ref, y_ref):
    h = (jnp.dot(s_ref[0].astype(jnp.bfloat16), w1_ref[0],
                 preferred_element_type=jnp.float32)
         + jnp.dot(s_ref[1].astype(jnp.bfloat16), w1_ref[1],
                   preferred_element_type=jnp.float32)
         + jnp.dot(s_ref[2].astype(jnp.bfloat16), w1_ref[2],
                   preferred_element_type=jnp.float32))
    h = jnp.maximum(h, 0.0).astype(jnp.bfloat16)       # (B, R)
    for i in range(3):                                 # static unroll over segments
        y_ref[i] = jax.nn.sigmoid(
            jnp.dot(h, w2_ref[i], preferred_element_type=jnp.float32))


# ----------------------------------------------------------------------------
# Kernel 3: SE channel scaling + 1x1 fusion conv (BN folded) + ReLU.
# grid = (3 segments,), accumulating into the resident (M, C) output.
# ----------------------------------------------------------------------------
def fuse_bn_relu_kernel(f_ref, y_ref, w_ref, b_ref, o_ref, *, B, HW):
    s = pl.program_id(0)

    @pl.when(s == 0)
    def _():
        o_ref[...] = jnp.broadcast_to(b_ref[...], o_ref.shape)

    c = f_ref.shape[2]
    f = f_ref[0].reshape(B, HW, c)                     # (B, HW, C)  f32
    gate = y_ref[0][:, None, :]                        # (B, 1,  C)  f32
    scaled = (f * gate).reshape(B * HW, c).astype(jnp.bfloat16)
    o_ref[...] += jnp.dot(scaled, w_ref[0], preferred_element_type=jnp.float32)

    @pl.when(s == pl.num_programs(0) - 1)
    def _():
        o_ref[...] = jnp.maximum(o_ref[...], 0.0)      # ReLU


# ----------------------------------------------------------------------------
# Parameter construction (deterministic, synthetic).
# ----------------------------------------------------------------------------
def init_msffe_params(key, C):
    CO = 3 * C
    R = CO // 16
    ks = jax.random.split(key, 12)
    (k1, k3, k5, kb, kf1, kf2, kwf, kbf, kg, kbt, krm, krv) = ks

    def nrm(k, shape, scale):
        return jax.random.normal(k, shape, jnp.float32) * scale

    w1c = nrm(k1, (C, C), 1.0 / math.sqrt(C))             # 1x1 conv (ci, co)
    w3c = nrm(k3, (3, 3, C, C), 1.0 / math.sqrt(9 * C))   # 3x3 conv
    w5c = nrm(k5, (5, 5, C, C), 1.0 / math.sqrt(25 * C))  # 5x5 conv

    # Packed nonzero weight slabs (35, C, C) in bf16 (MXU operand dtype).
    slots = [w1c]
    for dy in range(3):
        for dx in range(3):
            slots.append(w3c[dy, dx])
    for ky in range(5):
        for kx in range(5):
            slots.append(w5c[ky, kx])
    w_pack = jnp.stack(slots, axis=0).astype(jnp.bfloat16)        # (35, C, C)

    b_pack = nrm(kb, (3, 1, C), 0.01)                             # per-segment conv bias (f32)

    # SE MLP (bias=False), reshaped into per-segment slabs, bf16 for the MXU.
    w_se1 = nrm(kf1, (CO, R), 1.0 / math.sqrt(CO)).reshape(3, C, R).astype(jnp.bfloat16)
    w_se2 = jnp.transpose(nrm(kf2, (R, CO), 1.0 / math.sqrt(R)).reshape(R, 3, C),
                          (1, 0, 2)).astype(jnp.bfloat16)          # (3, R, C)

    # 1x1 fusion conv + eval-mode BatchNorm folded into weight/bias.
    w_fuse = nrm(kwf, (CO, C), 1.0 / math.sqrt(CO))
    b_fuse = nrm(kbf, (1, C), 0.01)
    gamma = 1.0 + nrm(kg, (1, C), 0.1)
    beta = nrm(kbt, (1, C), 0.1)
    run_mean = nrm(krm, (1, C), 0.1)
    run_var = 1.0 + 0.1 * jnp.abs(jax.random.normal(krv, (1, C), jnp.float32))
    eps = 1e-5
    bn_scale = gamma / jnp.sqrt(run_var + eps)
    bn_shift = beta - run_mean * bn_scale
    w_fuse_eff = (w_fuse * bn_scale).reshape(3, C, C).astype(jnp.bfloat16)  # (3, C, C)
    b_fuse_eff = b_fuse * bn_scale + bn_shift                               # (1, C) f32

    return dict(w_pack=w_pack, b_pack=b_pack, w_se1=w_se1, w_se2=w_se2,
                w_fuse=w_fuse_eff, b_fuse=b_fuse_eff)


# ----------------------------------------------------------------------------
# One MSFFE block.
# ----------------------------------------------------------------------------
@jax.jit
def msffe_forward(x_nchw, p):
    B, C, H, W = x_nchw.shape
    M, HW, CO = B * H * W, H * W, 3 * C
    R = CO // 16

    # --- glue: NCHW -> NHWC (bf16), im2col views for the 5x5 tap window ------
    x = jnp.transpose(x_nchw, (0, 2, 3, 1)).astype(jnp.bfloat16)   # (B, H, W, C)
    xp = jnp.pad(x, ((0, 0), (2, 2), (2, 2), (0, 0)))
    patches = jnp.stack(
        [xp[:, ky:ky + H, kx:kx + W, :].reshape(M, C)
         for ky in range(5) for kx in range(5)], axis=0)           # (25, M, C) bf16

    # --- kernel 1: packed multi-scale conv + SE squeeze ----------------------
    k1_est = 2 * (M * C * 2 + C * C * 2 + C * 4 + M * C * 4 + B * C * 4)
    fused, s = pl.pallas_call(
        functools.partial(conv_ms_kernel, B=B, HW=HW),
        grid_spec=pltpu.PrefetchScalarGridSpec(
            num_scalar_prefetch=4,
            grid=(N_SLOTS,),
            in_specs=[
                pl.BlockSpec((1, M, C), lambda g, tap, seg, fst, lst: (tap[g], 0, 0)),
                pl.BlockSpec((1, C, C), lambda g, tap, seg, fst, lst: (g, 0, 0)),
                pl.BlockSpec((1, 1, C), lambda g, tap, seg, fst, lst: (seg[g], 0, 0)),
            ],
            out_specs=[
                pl.BlockSpec((1, M, C), lambda g, tap, seg, fst, lst: (seg[g], 0, 0)),
                pl.BlockSpec((1, B, C), lambda g, tap, seg, fst, lst: (seg[g], 0, 0)),
            ]),
        out_shape=(jax.ShapeDtypeStruct((3, M, C), jnp.float32),
                   jax.ShapeDtypeStruct((3, B, C), jnp.float32)),
        compiler_params=pltpu.CompilerParams(
            dimension_semantics=("arbitrary",),
            vmem_limit_bytes=_vmem_limit(k1_est)),
    )(TAP_IDX, SEG_IDX, FIRST_IDX, LAST_IDX, patches, p["w_pack"], p["b_pack"])

    # --- kernel 2: fused SE excitation MLP ------------------------------------
    vmem_spec = pl.BlockSpec(memory_space=pltpu.MemorySpace.VMEM)
    se_est = 2 * (3 * B * C * 4) + 3 * C * R * 2 + 3 * R * C * 2
    y = pl.pallas_call(
        se_kernel,
        out_shape=jax.ShapeDtypeStruct((3, B, C), jnp.float32),
        in_specs=[vmem_spec, vmem_spec, vmem_spec],
        out_specs=vmem_spec,
        compiler_params=pltpu.CompilerParams(vmem_limit_bytes=_vmem_limit(se_est)),
    )(s, p["w_se1"], p["w_se2"])

    # --- kernel 3: SE scale + fusion conv (BN folded) + ReLU ------------------
    k4_est = 2 * (M * C * 4 + B * C * 4 + C * C * 2 + C * 4 + M * C * 4)
    out = pl.pallas_call(
        functools.partial(fuse_bn_relu_kernel, B=B, HW=HW),
        grid_spec=pltpu.PrefetchScalarGridSpec(
            num_scalar_prefetch=0,
            grid=(3,),
            in_specs=[
                pl.BlockSpec((1, M, C), lambda sgm: (sgm, 0, 0)),
                pl.BlockSpec((1, B, C), lambda sgm: (sgm, 0, 0)),
                pl.BlockSpec((1, C, C), lambda sgm: (sgm, 0, 0)),
                pl.BlockSpec((1, C), lambda sgm: (0, 0)),
            ],
            out_specs=pl.BlockSpec((M, C), lambda sgm: (0, 0))),
        out_shape=jax.ShapeDtypeStruct((M, C), jnp.float32),
        compiler_params=pltpu.CompilerParams(
            dimension_semantics=("arbitrary",),
            vmem_limit_bytes=_vmem_limit(k4_est)),
    )(fused, y, p["w_fuse"], p["b_fuse"])

    # back to NCHW to match the PyTorch module's convention.
    return jnp.transpose(out.reshape(B, H, W, C), (0, 3, 1, 2))


def msffe_model_forward(feats, params_list):
    return [msffe_forward(f, p) for f, p in zip(feats, params_list)]


# ----------------------------------------------------------------------------
if __name__ == "__main__":
    key = jax.random.PRNGKey(0)
    B, H, W = 2, 8, 8
    channels = [64, 256, 512, 1024, 2048]   # fixed by MSFFE_Model.__init__

    feat_keys = jax.random.split(jax.random.fold_in(key, 1), len(channels))
    param_keys = jax.random.split(jax.random.fold_in(key, 2), len(channels))

    feats = [jax.random.normal(k, (B, c, H, W), jnp.float32)
             for k, c in zip(feat_keys, channels)]
    params_list = [init_msffe_params(k, c) for k, c in zip(param_keys, channels)]

    outs = msffe_model_forward(feats, params_list)
    outs = [jax.block_until_ready(o) for o in outs]

    for o, c in zip(outs, channels):
        assert o.shape == (B, c, H, W), o.shape
        assert bool(jnp.all(jnp.isfinite(o)))
        assert bool(jnp.all(o >= 0.0))       # final ReLU

    print("KERNEL_OK")
</pallas_src>

<mosaic_0001>
module attributes {stable_mosaic.version = 11 : i64} {
  func.func @fuse_bn_relu_kernel(%arg0: i32, %arg1: memref<1x128x64xf32, #tpu.memory_space<vmem>>, %arg2: memref<1x2x64xf32, #tpu.memory_space<vmem>>, %arg3: memref<1x64x64xbf16, #tpu.memory_space<vmem>>, %arg4: memref<1x64xf32, #tpu.memory_space<vmem>>, %arg5: memref<128x64xf32, #tpu.memory_space<vmem>>) attributes {dimension_semantics = [#tpu.dimension_semantics<arbitrary>], iteration_bounds = array<i64: 3>, scalar_prefetch = 0 : i64, scratch_operands = 0 : i64, tpu.core_type = #tpu.core_type<tc>, window_params = [{transform_indices = @transform_0, window_bounds = array<i64: 1, 128, 64>}, {transform_indices = @transform_1, window_bounds = array<i64: 1, 2, 64>}, {transform_indices = @transform_2, window_bounds = array<i64: 1, 64, 64>}, {pipeline_mode = #tpu.pipeline_mode<synchronous>, transform_indices = @transform_3, window_bounds = array<i64: 1, 64>}, {pipeline_mode = #tpu.pipeline_mode<synchronous>, transform_indices = @transform_4, window_bounds = array<i64: 128, 64>}]} {
    %c0_i32 = arith.constant 0 : i32
    %0 = arith.cmpi eq, %arg0, %c0_i32 : i32
    %1 = arith.extui %0 : i1 to i32
    %c0_i32_0 = arith.constant 0 : i32
    %2 = arith.cmpi ne, %1, %c0_i32_0 : i32
    scf.if %2 {
      %c0_14 = arith.constant 0 : index
      %c0_15 = arith.constant 0 : index
      %22 = vector.load %arg4[%c0_14, %c0_15] : memref<1x64xf32, #tpu.memory_space<vmem>>, vector<1x64xf32>
      %23 = vector.shape_cast %22 : vector<1x64xf32> to vector<1x64xf32>
      %24 = vector.broadcast %23 : vector<1x64xf32> to vector<128x64xf32>
      %c0_16 = arith.constant 0 : index
      %c0_17 = arith.constant 0 : index
      %25 = vector.load %arg5[%c0_16, %c0_17] : memref<128x64xf32, #tpu.memory_space<vmem>>, vector<128x64xf32>
      tpu.vector_store %arg5[%c0_16, %c0_17], %24 {strides = array<i32>} : memref<128x64xf32, #tpu.memory_space<vmem>>, vector<128x64xf32>,
    } else {
    }
    %c0 = arith.constant 0 : index
    %c0_1 = arith.constant 0 : index
    %c0_2 = arith.constant 0 : index
    %3 = vector.load %arg1[%c0, %c0_1, %c0_2] : memref<1x128x64xf32, #tpu.memory_space<vmem>>, vector<1x128x64xf32>
    %4 = vector.shape_cast %3 : vector<1x128x64xf32> to vector<128x64xf32>
    %5 = vector.shape_cast %4 : vector<128x64xf32> to vector<2x64x64xf32>
    %c0_3 = arith.constant 0 : index
    %c0_4 = arith.constant 0 : index
    %c0_5 = arith.constant 0 : index
    %6 = vector.load %arg2[%c0_3, %c0_4, %c0_5] : memref<1x2x64xf32, #tpu.memory_space<vmem>>, vector<1x2x64xf32>
    %7 = vector.shape_cast %6 : vector<1x2x64xf32> to vector<2x64xf32>
    %8 = vector.shape_cast %7 : vector<2x64xf32> to vector<2x1x64xf32>
    %9 = vector.broadcast %8 : vector<2x1x64xf32> to vector<2x64x64xf32>
    %10 = arith.mulf %5, %9 : vector<2x64x64xf32>
    %11 = vector.shape_cast %10 : vector<2x64x64xf32> to vector<128x64xf32>
    %12 = arith.truncf %11 : vector<128x64xf32> to vector<128x64xbf16>
    %c0_6 = arith.constant 0 : index
    %c0_7 = arith.constant 0 : index
    %13 = vector.load %arg5[%c0_6, %c0_7] : memref<128x64xf32, #tpu.memory_space<vmem>>, vector<128x64xf32>
    %c0_8 = arith.constant 0 : index
    %c0_9 = arith.constant 0 : index
    %c0_10 = arith.constant 0 : index
    %14 = vector.load %arg3[%c0_8, %c0_9, %c0_10] : memref<1x64x64xbf16, #tpu.memory_space<vmem>>, vector<1x64x64xbf16>
    %15 = vector.shape_cast %14 : vector<1x64x64xbf16> to vector<64x64xbf16>
    %cst = arith.constant dense<0.000000e+00> : vector<128x64xf32>
    %16 = tpu.matmul %12, %15, %cst {dimension_numbers = #tpu.dot_dimension_numbers<[1], [0], [0], [1], [0, 0, 1, 1], [], []>} : vector<128x64xbf16>, vector<64x64xbf16>, vector<128x64xf32> -> vector<128x64xf32>
    %17 = arith.addf %13, %16 : vector<128x64xf32>
    %c0_11 = arith.constant 0 : index
    %c0_12 = arith.constant 0 : index
    %18 = vector.load %arg5[%c0_11, %c0_12] : memref<128x64xf32, #tpu.memory_space<vmem>>, vector<128x64xf32>
    tpu.vector_store %arg5[%c0_11, %c0_12], %17 {strides = array<i32>} : memref<128x64xf32, #tpu.memory_space<vmem>>, vector<128x64xf32>,
    %c2_i32 = arith.constant 2 : i32
    %19 = arith.cmpi eq, %arg0, %c2_i32 : i32
    %20 = arith.extui %19 : i1 to i32
    %c0_i32_13 = arith.constant 0 : i32
    %21 = arith.cmpi ne, %20, %c0_i32_13 : i32
    scf.if %21 {
      %c0_14 = arith.constant 0 : index
      %c0_15 = arith.constant 0 : index
      %22 = vector.load %arg5[%c0_14, %c0_15] : memref<128x64xf32, #tpu.memory_space<vmem>>, vector<128x64xf32>
      %cst_16 = arith.constant 0.000000e+00 : f32
      %23 = vector.broadcast %cst_16 : f32 to vector<128x64xf32>
      %24 = arith.maximumf %22, %23 : vector<128x64xf32>
      %c0_17 = arith.constant 0 : index
      %c0_18 = arith.constant 0 : index
      %25 = vector.load %arg5[%c0_17, %c0_18] : memref<128x64xf32, #tpu.memory_space<vmem>>, vector<128x64xf32>
      tpu.vector_store %arg5[%c0_17, %c0_18], %24 {strides = array<i32>} : memref<128x64xf32, #tpu.memory_space<vmem>>, vector<128x64xf32>,
    } else {
    }
    return
  }
  func.func @transform_0(%arg0: i32) -> (i32, i32, i32) {
    %c0_i32 = arith.constant 0 : i32
    %c0_i32_0 = arith.constant 0 : i32
    %c0_i32_1 = arith.constant 0 : i32
    return %arg0, %c0_i32, %c0_i32_0 : i32, i32, i32
  }
  func.func @transform_1(%arg0: i32) -> (i32, i32, i32) {
    %c0_i32 = arith.constant 0 : i32
    %c0_i32_0 = arith.constant 0 : i32
    %c0_i32_1 = arith.constant 0 : i32
    return %arg0, %c0_i32, %c0_i32_0 : i32, i32, i32
  }
  func.func @transform_2(%arg0: i32) -> (i32, i32, i32) {
    %c0_i32 = arith.constant 0 : i32
    %c0_i32_0 = arith.constant 0 : i32
    %c0_i32_1 = arith.constant 0 : i32
    return %arg0, %c0_i32, %c0_i32_0 : i32, i32, i32
  }
  func.func @transform_3(%arg0: i32) -> (i32, i32) {
    %c0_i32 = arith.constant 0 : i32
    %c0_i32_0 = arith.constant 0 : i32
    %c0_i32_1 = arith.constant 0 : i32
    return %c0_i32, %c0_i32_0 : i32, i32
  }
  func.func @transform_4(%arg0: i32) -> (i32, i32) {
    %c0_i32 = arith.constant 0 : i32
    %c0_i32_0 = arith.constant 0 : i32
    %c0_i32_1 = arith.constant 0 : i32
    return %c0_i32, %c0_i32_0 : i32, i32
  }
}

module attributes {stable_mosaic.version = 11 : i64} {
  func.func @conv_ms_kernel(%arg0: i32, %arg1: memref<35xi32, #tpu.memory_space<smem>>, %arg2: memref<35xi32, #tpu.memory_space<smem>>, %arg3: memref<35xi32, #tpu.memory_space<smem>>, %arg4: memref<35xi32, #tpu.memory_space<smem>>, %arg5: memref<1x128x64xbf16, #tpu.memory_space<vmem>>, %arg6: memref<1x64x64xbf16, #tpu.memory_space<vmem>>, %arg7: memref<1x1x64xf32, #tpu.memory_space<vmem>>, %arg8: memref<1x128x64xf32, #tpu.memory_space<vmem>>, %arg9: memref<1x2x64xf32, #tpu.memory_space<vmem>>) attributes {dimension_semantics = [#tpu.dimension_semantics<arbitrary>], iteration_bounds = array<i64: 35>, scalar_prefetch = 4 : i64, scratch_operands = 0 : i64, tpu.core_type = #tpu.core_type<tc>, window_params = [{transform_indices = @transform_0, window_bounds = array<i64: 1, 128, 64>}, {transform_indices = @transform_1, window_bounds = array<i64: 1, 64, 64>}, {transform_indices = @transform_2, window_bounds = array<i64: 1, 1, 64>}, {transform_indices = @transform_3, window_bounds = array<i64: 1, 128, 64>}, {transform_indices = @transform_4, window_bounds = array<i64: 1, 2, 64>}]} {
    %0 = arith.index_cast %arg0 : i32 to index
    %1 = memref.load %arg3[%0] : memref<35xi32, #tpu.memory_space<smem>>
    %c1_i32 = arith.constant 1 : i32
    %2 = arith.cmpi eq, %1, %c1_i32 : i32
    %3 = arith.extui %2 : i1 to i32
    %c0_i32 = arith.constant 0 : i32
    %4 = arith.cmpi ne, %3, %c0_i32 : i32
    scf.if %4 {
      %c0_13 = arith.constant 0 : index
      %c0_14 = arith.constant 0 : index
      %c0_15 = arith.constant 0 : index
      %21 = vector.load %arg7[%c0_13, %c0_14, %c0_15] : memref<1x1x64xf32, #tpu.memory_space<vmem>>, vector<1x1x64xf32>
      %22 = vector.shape_cast %21 : vector<1x1x64xf32> to vector<1x1x64xf32>
      %23 = vector.broadcast %22 : vector<1x1x64xf32> to vector<1x128x64xf32>
      %c0_16 = arith.constant 0 : index
      %c0_17 = arith.constant 0 : index
      %c0_18 = arith.constant 0 : index
      %24 = vector.load %arg8[%c0_16, %c0_17, %c0_18] : memref<1x128x64xf32, #tpu.memory_space<vmem>>, vector<1x128x64xf32>
      tpu.vector_store %arg8[%c0_16, %c0_17, %c0_18], %23 {strides = array<i32>} : memref<1x128x64xf32, #tpu.memory_space<vmem>>, vector<1x128x64xf32>,
    } else {
    }
    %c0 = arith.constant 0 : index
    %c0_0 = arith.constant 0 : index
    %c0_1 = arith.constant 0 : index
    %5 = vector.load %arg8[%c0, %c0_0, %c0_1] : memref<1x128x64xf32, #tpu.memory_space<vmem>>, vector<1x128x64xf32>
    %6 = vector.shape_cast %5 : vector<1x128x64xf32> to vector<128x64xf32>
    %c0_2 = arith.constant 0 : index
    %c0_3 = arith.constant 0 : index
    %c0_4 = arith.constant 0 : index
    %7 = vector.load %arg5[%c0_2, %c0_3, %c0_4] : memref<1x128x64xbf16, #tpu.memory_space<vmem>>, vector<1x128x64xbf16>
    %8 = vector.shape_cast %7 : vector<1x128x64xbf16> to vector<128x64xbf16>
    %c0_5 = arith.constant 0 : index
    %c0_6 = arith.constant 0 : index
    %c0_7 = arith.constant 0 : index
    %9 = vector.load %arg6[%c0_5, %c0_6, %c0_7] : memref<1x64x64xbf16, #tpu.memory_space<vmem>>, vector<1x64x64xbf16>
    %10 = vector.shape_cast %9 : vector<1x64x64xbf16> to vector<64x64xbf16>
    %cst = arith.constant dense<0.000000e+00> : vector<128x64xf32>
    %11 = tpu.matmul %8, %10, %cst {dimension_numbers = #tpu.dot_dimension_numbers<[1], [0], [0], [1], [0, 0, 1, 1], [], []>} : vector<128x64xbf16>, vector<64x64xbf16>, vector<128x64xf32> -> vector<128x64xf32>
    %12 = arith.addf %6, %11 : vector<128x64xf32>
    %c0_8 = arith.constant 0 : index
    %c0_9 = arith.constant 0 : index
    %c0_10 = arith.constant 0 : index
    %13 = vector.load %arg8[%c0_8, %c0_9, %c0_10] : memref<1x128x64xf32, #tpu.memory_space<vmem>>, vector<1x128x64xf32>
    %14 = vector.shape_cast %13 : vector<1x128x64xf32> to vector<128x64xf32>
    %15 = vector.shape_cast %12 : vector<128x64xf32> to vector<1x128x64xf32>
    tpu.vector_store %arg8[%c0_8, %c0_9, %c0_10], %15 {strides = array<i32>} : memref<1x128x64xf32, #tpu.memory_space<vmem>>, vector<1x128x64xf32>,
    %16 = arith.index_cast %arg0 : i32 to index
    %17 = memref.load %arg4[%16] : memref<35xi32, #tpu.memory_space<smem>>
    %c1_i32_11 = arith.constant 1 : i32
    %18 = arith.cmpi eq, %17, %c1_i32_11 : i32
    %19 = arith.extui %18 : i1 to i32
    %c0_i32_12 = arith.constant 0 : i32
    %20 = arith.cmpi ne, %19, %c0_i32_12 : i32
    scf.if %20 {
      %c0_13 = arith.constant 0 : index
      %c0_14 = arith.constant 0 : index
      %c0_15 = arith.constant 0 : index
      %21 = vector.load %arg8[%c0_13, %c0_14, %c0_15] : memref<1x128x64xf32, #tpu.memory_space<vmem>>, vector<1x128x64xf32>
      %22 = vector.shape_cast %21 : vector<1x128x64xf32> to vector<128x64xf32>
      %23 = vector.shape_cast %22 : vector<128x64xf32> to vector<2x64x64xf32>
      %cst_16 = arith.constant dense<0.000000e+00> : vector<2x64xf32>
      %24 = vector.multi_reduction <add>, %23, %cst_16 [1] : vector<2x64x64xf32> to vector<2x64xf32>
      %cst_17 = arith.constant 6.400000e+01 : f32
      %25 = vector.broadcast %cst_17 : f32 to vector<2x64xf32>
      %26 = arith.divf %24, %25 : vector<2x64xf32>
      %c0_18 = arith.constant 0 : index
      %c0_19 = arith.constant 0 : index
      %c0_20 = arith.constant 0 : index
      %27 = vector.load %arg9[%c0_18, %c0_19, %c0_20] : memref<1x2x64xf32, #tpu.memory_space<vmem>>, vector<1x2x64xf32>
      %28 = vector.shape_cast %27 : vector<1x2x64xf32> to vector<2x64xf32>
      %29 = vector.shape_cast %26 : vector<2x64xf32> to vector<1x2x64xf32>
      tpu.vector_store %arg9[%c0_18, %c0_19, %c0_20], %29 {strides = array<i32>} : memref<1x2x64xf32, #tpu.memory_space<vmem>>, vector<1x2x64xf32>,
    } else {
    }
    return
  }
  func.func @transform_0(%arg0: i32, %arg1: memref<35xi32, #tpu.memory_space<smem>>, %arg2: memref<35xi32, #tpu.memory_space<smem>>, %arg3: memref<35xi32, #tpu.memory_space<smem>>, %arg4: memref<35xi32, #tpu.memory_space<smem>>) -> (i32, i32, i32) {
    %0 = arith.index_cast %arg0 : i32 to index
    %1 = memref.load %arg1[%0] : memref<35xi32, #tpu.memory_space<smem>>
    %c0_i32 = arith.constant 0 : i32
    %c0_i32_0 = arith.constant 0 : i32
    %c0_i32_1 = arith.constant 0 : i32
    return %1, %c0_i32, %c0_i32_0 : i32, i32, i32
  }
  func.func @transform_1(%arg0: i32, %arg1: memref<35xi32, #tpu.memory_space<smem>>, %arg2: memref<35xi32, #tpu.memory_space<smem>>, %arg3: memref<35xi32, #tpu.memory_space<smem>>, %arg4: memref<35xi32, #tpu.memory_space<smem>>) -> (i32, i32, i32) {
    %c0_i32 = arith.constant 0 : i32
    %c0_i32_0 = arith.constant 0 : i32
    %c0_i32_1 = arith.constant 0 : i32
    return %arg0, %c0_i32, %c0_i32_0 : i32, i32, i32
  }
  func.func @transform_2(%arg0: i32, %arg1: memref<35xi32, #tpu.memory_space<smem>>, %arg2: memref<35xi32, #tpu.memory_space<smem>>, %arg3: memref<35xi32, #tpu.memory_space<smem>>, %arg4: memref<35xi32, #tpu.memory_space<smem>>) -> (i32, i32, i32) {
    %0 = arith.index_cast %arg0 : i32 to index
    %1 = memref.load %arg2[%0] : memref<35xi32, #tpu.memory_space<smem>>
    %c0_i32 = arith.constant 0 : i32
    %c0_i32_0 = arith.constant 0 : i32
    %c0_i32_1 = arith.constant 0 : i32
    return %1, %c0_i32, %c0_i32_0 : i32, i32, i32
  }
  func.func @transform_3(%arg0: i32, %arg1: memref<35xi32, #tpu.memory_space<smem>>, %arg2: memref<35xi32, #tpu.memory_space<smem>>, %arg3: memref<35xi32, #tpu.memory_space<smem>>, %arg4: memref<35xi32, #tpu.memory_space<smem>>) -> (i32, i32, i32) {
    %0 = arith.index_cast %arg0 : i32 to index
    %1 = memref.load %arg2[%0] : memref<35xi32, #tpu.memory_space<smem>>
    %c0_i32 = arith.constant 0 : i32
    %c0_i32_0 = arith.constant 0 : i32
    %c0_i32_1 = arith.constant 0 : i32
    return %1, %c0_i32, %c0_i32_0 : i32, i32, i32
  }
  func.func @transform_4(%arg0: i32, %arg1: memref<35xi32, #tpu.memory_space<smem>>, %arg2: memref<35xi32, #tpu.memory_space<smem>>, %arg3: memref<35xi32, #tpu.memory_space<smem>>, %arg4: memref<35xi32, #tpu.memory_space<smem>>) -> (i32, i32, i32) {
    %0 = arith.index_cast %arg0 : i32 to index
    %1 = memref.load %arg2[%0] : memref<35xi32, #tpu.memory_space<smem>>
    %c0_i32 = arith.constant 0 : i32
    %c0_i32_0 = arith.constant 0 : i32
    %c0_i32_1 = arith.constant 0 : i32
    return %1, %c0_i32, %c0_i32_0 : i32, i32, i32
  }
}

module attributes {stable_mosaic.version = 11 : i64} {
  func.func @se_kernel(%arg0: memref<3x2x64xf32, #tpu.memory_space<vmem>>, %arg1: memref<3x64x12xbf16, #tpu.memory_space<vmem>>, %arg2: memref<3x12x64xbf16, #tpu.memory_space<vmem>>, %arg3: memref<3x2x64xf32, #tpu.memory_space<vmem>>) attributes {dimension_semantics = [], scalar_prefetch = 0 : i64, scratch_operands = 0 : i64, tpu.core_type = #tpu.core_type<tc>} {
    %c0 = arith.constant 0 : index
    %c0_0 = arith.constant 0 : index
    %c0_1 = arith.constant 0 : index
    %0 = vector.load %arg0[%c0, %c0_0, %c0_1] : memref<3x2x64xf32, #tpu.memory_space<vmem>>, vector<1x2x64xf32>
    %1 = vector.shape_cast %0 : vector<1x2x64xf32> to vector<2x64xf32>
    %2 = arith.truncf %1 : vector<2x64xf32> to vector<2x64xbf16>
    %c0_2 = arith.constant 0 : index
    %c0_3 = arith.constant 0 : index
    %c0_4 = arith.constant 0 : index
    %3 = vector.load %arg1[%c0_2, %c0_3, %c0_4] : memref<3x64x12xbf16, #tpu.memory_space<vmem>>, vector<1x64x12xbf16>
    %4 = vector.shape_cast %3 : vector<1x64x12xbf16> to vector<64x12xbf16>
    %cst = arith.constant dense<0.000000e+00> : vector<2x12xf32>
    %5 = tpu.matmul %2, %4, %cst {dimension_numbers = #tpu.dot_dimension_numbers<[1], [0], [0], [1], [0, 0, 1, 1], [], []>} : vector<2x64xbf16>, vector<64x12xbf16>, vector<2x12xf32> -> vector<2x12xf32>
    %c1 = arith.constant 1 : index
    %c0_5 = arith.constant 0 : index
    %c0_6 = arith.constant 0 : index
    %6 = vector.load %arg0[%c1, %c0_5, %c0_6] : memref<3x2x64xf32, #tpu.memory_space<vmem>>, vector<1x2x64xf32>
    %7 = vector.shape_cast %6 : vector<1x2x64xf32> to vector<2x64xf32>
    %8 = arith.truncf %7 : vector<2x64xf32> to vector<2x64xbf16>
    %c1_7 = arith.constant 1 : index
    %c0_8 = arith.constant 0 : index
    %c0_9 = arith.constant 0 : index
    %9 = vector.load %arg1[%c1_7, %c0_8, %c0_9] : memref<3x64x12xbf16, #tpu.memory_space<vmem>>, vector<1x64x12xbf16>
    %10 = vector.shape_cast %9 : vector<1x64x12xbf16> to vector<64x12xbf16>
    %cst_10 = arith.constant dense<0.000000e+00> : vector<2x12xf32>
    %11 = tpu.matmul %8, %10, %cst_10 {dimension_numbers = #tpu.dot_dimension_numbers<[1], [0], [0], [1], [0, 0, 1, 1], [], []>} : vector<2x64xbf16>, vector<64x12xbf16>, vector<2x12xf32> -> vector<2x12xf32>
    %12 = arith.addf %5, %11 : vector<2x12xf32>
    %c2 = arith.constant 2 : index
    %c0_11 = arith.constant 0 : index
    %c0_12 = arith.constant 0 : index
    %13 = vector.load %arg0[%c2, %c0_11, %c0_12] : memref<3x2x64xf32, #tpu.memory_space<vmem>>, vector<1x2x64xf32>
    %14 = vector.shape_cast %13 : vector<1x2x64xf32> to vector<2x64xf32>
    %15 = arith.truncf %14 : vector<2x64xf32> to vector<2x64xbf16>
    %c2_13 = arith.constant 2 : index
    %c0_14 = arith.constant 0 : index
    %c0_15 = arith.constant 0 : index
    %16 = vector.load %arg1[%c2_13, %c0_14, %c0_15] : memref<3x64x12xbf16, #tpu.memory_space<vmem>>, vector<1x64x12xbf16>
    %17 = vector.shape_cast %16 : vector<1x64x12xbf16> to vector<64x12xbf16>
    %cst_16 = arith.constant dense<0.000000e+00> : vector<2x12xf32>
    %18 = tpu.matmul %15, %17, %cst_16 {dimension_numbers = #tpu.dot_dimension_numbers<[1], [0], [0], [1], [0, 0, 1, 1], [], []>} : vector<2x64xbf16>, vector<64x12xbf16>, vector<2x12xf32> -> vector<2x12xf32>
    %19 = arith.addf %12, %18 : vector<2x12xf32>
    %cst_17 = arith.constant 0.000000e+00 : f32
    %20 = vector.broadcast %cst_17 : f32 to vector<2x12xf32>
    %21 = arith.maximumf %19, %20 : vector<2x12xf32>
    %22 = arith.truncf %21 : vector<2x12xf32> to vector<2x12xbf16>
    %c0_18 = arith.constant 0 : index
    %c0_19 = arith.constant 0 : index
    %c0_20 = arith.constant 0 : index
    %23 = vector.load %arg2[%c0_18, %c0_19, %c0_20] : memref<3x12x64xbf16, #tpu.memory_space<vmem>>, vector<1x12x64xbf16>
    %24 = vector.shape_cast %23 : vector<1x12x64xbf16> to vector<12x64xbf16>
    %cst_21 = arith.constant dense<0.000000e+00> : vector<2x64xf32>
    %25 = tpu.matmul %22, %24, %cst_21 {dimension_numbers = #tpu.dot_dimension_numbers<[1], [0], [0], [1], [0, 0, 1, 1], [], []>} : vector<2x12xbf16>, vector<12x64xbf16>, vector<2x64xf32> -> vector<2x64xf32>
    %26 = arith.negf %25 : vector<2x64xf32>
    %27 = math.exp %26 : vector<2x64xf32>
    %cst_22 = arith.constant 1.000000e+00 : f32
    %28 = vector.broadcast %cst_22 : f32 to vector<2x64xf32>
    %29 = arith.addf %28, %27 : vector<2x64xf32>
    %30 = arith.divf %28, %29 : vector<2x64xf32>
    %c0_23 = arith.constant 0 : index
    %c0_24 = arith.constant 0 : index
    %c0_25 = arith.constant 0 : index
    %31 = vector.load %arg3[%c0_23, %c0_24, %c0_25] : memref<3x2x64xf32, #tpu.memory_space<vmem>>, vector<1x2x64xf32>
    %32 = vector.shape_cast %31 : vector<1x2x64xf32> to vector<2x64xf32>
    %33 = vector.shape_cast %30 : vector<2x64xf32> to vector<1x2x64xf32>
    tpu.vector_store %arg3[%c0_23, %c0_24, %c0_25], %33 {strides = array<i32>} : memref<3x2x64xf32, #tpu.memory_space<vmem>>, vector<1x2x64xf32>,
    %c1_26 = arith.constant 1 : index
    %c0_27 = arith.constant 0 : index
    %c0_28 = arith.constant 0 : index
    %34 = vector.load %arg2[%c1_26, %c0_27, %c0_28] : memref<3x12x64xbf16, #tpu.memory_space<vmem>>, vector<1x12x64xbf16>
    %35 = vector.shape_cast %34 : vector<1x12x64xbf16> to vector<12x64xbf16>
    %cst_29 = arith.constant dense<0.000000e+00> : vector<2x64xf32>
    %36 = tpu.matmul %22, %35, %cst_29 {dimension_numbers = #tpu.dot_dimension_numbers<[1], [0], [0], [1], [0, 0, 1, 1], [], []>} : vector<2x12xbf16>, vector<12x64xbf16>, vector<2x64xf32> -> vector<2x64xf32>
    %37 = arith.negf %36 : vector<2x64xf32>
    %38 = math.exp %37 : vector<2x64xf32>
    %cst_30 = arith.constant 1.000000e+00 : f32
    %39 = vector.broadcast %cst_30 : f32 to vector<2x64xf32>
    %40 = arith.addf %39, %38 : vector<2x64xf32>
    %41 = arith.divf %39, %40 : vector<2x64xf32>
    %c1_31 = arith.constant 1 : index
    %c0_32 = arith.constant 0 : index
    %c0_33 = arith.constant 0 : index
    %42 = vector.load %arg3[%c1_31, %c0_32, %c0_33] : memref<3x2x64xf32, #tpu.memory_space<vmem>>, vector<1x2x64xf32>
    %43 = vector.shape_cast %42 : vector<1x2x64xf32> to vector<2x64xf32>
    %44 = vector.shape_cast %41 : vector<2x64xf32> to vector<1x2x64xf32>
    tpu.vector_store %arg3[%c1_31, %c0_32, %c0_33], %44 {strides = array<i32>} : memref<3x2x64xf32, #tpu.memory_space<vmem>>, vector<1x2x64xf32>,
    %c2_34 = arith.constant 2 : index
    %c0_35 = arith.constant 0 : index
    %c0_36 = arith.constant 0 : index
    %45 = vector.load %arg2[%c2_34, %c0_35, %c0_36] : memref<3x12x64xbf16, #tpu.memory_space<vmem>>, vector<1x12x64xbf16>
    %46 = vector.shape_cast %45 : vector<1x12x64xbf16> to vector<12x64xbf16>
    %cst_37 = arith.constant dense<0.000000e+00> : vector<2x64xf32>
    %47 = tpu.matmul %22, %46, %cst_37 {dimension_numbers = #tpu.dot_dimension_numbers<[1], [0], [0], [1], [0, 0, 1, 1], [], []>} : vector<2x12xbf16>, vector<12x64xbf16>, vector<2x64xf32> -> vector<2x64xf32>
    %48 = arith.negf %47 : vector<2x64xf32>
    %49 = math.exp %48 : vector<2x64xf32>
    %cst_38 = arith.constant 1.000000e+00 : f32
    %50 = vector.broadcast %cst_38 : f32 to vector<2x64xf32>
    %51 = arith.addf %50, %49 : vector<2x64xf32>
    %52 = arith.divf %50, %51 : vector<2x64xf32>
    %c2_39 = arith.constant 2 : index
    %c0_40 = arith.constant 0 : index
    %c0_41 = arith.constant 0 : index
    %53 = vector.load %arg3[%c2_39, %c0_40, %c0_41] : memref<3x2x64xf32, #tpu.memory_space<vmem>>, vector<1x2x64xf32>
    %54 = vector.shape_cast %53 : vector<1x2x64xf32> to vector<2x64xf32>
    %55 = vector.shape_cast %52 : vector<2x64xf32> to vector<1x2x64xf32>
    tpu.vector_store %arg3[%c2_39, %c0_40, %c0_41], %55 {strides = array<i32>} : memref<3x2x64xf32, #tpu.memory_space<vmem>>, vector<1x2x64xf32>,
    return
  }
}

</mosaic_0001>

<bundles_post_ra>
// kernel: msffe_forward.3
= control target key start
LH: loop header
LB: loop body
LE: loop exit
PB: predicated region body
PF: predicated region fallthrough
CT: control target
= control target key end

     0   :  { %s1170_s0 = inlined_call_operand.vmem [shape: s32[35], index: 0, kind: input, shape index: {}]   ;;  %s1171_s4 = inlined_call_operand.vmem [shape: bf16[25,128,64], index: 4, kind: input, shape index: {}]   ;;  %s1172_s5 = inlined_call_operand.vmem [shape: bf16[35,64,64], index: 5, kind: input, shape index: {}]   ;;  %s1173_s6 = inlined_call_operand.vmem [shape: f32[3,1,64], index: 6, kind: input, shape index: {}]   ;;  %s1174_s7 = inlined_call_operand.vmem [shape: f32[3,128,64], index: 7, kind: output, shape index: {0}]   ;;  %s1175_s8 = inlined_call_operand.vmem [shape: f32[3,2,64], index: 8, kind: output, shape index: {1}]   ;;  %s1176_s1 = inlined_call_operand.vmem [shape: s32[35], index: 1, kind: input, shape index: {}]   ;;  %s1177_s2 = inlined_call_operand.vmem [shape: s32[35], index: 2, kind: input, shape index: {}]   ;;  %s1178_s3 = inlined_call_operand.vmem [shape: s32[35], index: 3, kind: input, shape index: {}]  }
   0x1   :  { %s14_s29 = sshll.u32 %s1170_s0, 4  ;;  %s18_s10 = sshll.u32 %s1176_s1, 4  ;;  %s15_s29 = int_to_ptr.vmem [resolvable:$true] %s14_s29  ;;  %s19_s10 = int_to_ptr.vmem [resolvable:$true] %s18_s10 }
   0x2   :  { %s871_s11 = scalar_lea.vmem %s15_s29, 16  ;;  %p876_p1 = scmp.lt.s32.totalorder %s15_s29, %s15_s29 }
   0x3   :  { %p872_p0 = scmp.ne.s32.totalorder %s15_s29, %s871_s11  ;;  %p877_p2 = scmp.lt.s32.totalorder %s871_s11, %s871_s11 }
   0x5   :  { %p878_p3 = por %p877_p2, %p876_p1 }
   0x7   :  { %p879_p4 = pnand %p878_p3, %p872_p0 }
   0x9   :  { %882 = shalt.err (!%p879_p4)  }
   0xa   :  { %s929_s12 = smov [#allocation3]   ;;  %s883_s13 = scalar_lea.vmem %s19_s10, 16 }
   0xb   :  { %17 = dma.vmem_to_smem %s15_s29, 16, %s929_s12, [#allocation2] }
   0xc   :  { %p884_p5 = scmp.ne.s32.totalorder %s19_s10, %s883_s13  ;;  %p888_p6 = scmp.lt.s32.totalorder %s19_s10, %s19_s10 }
   0xd   :  { %p889_p7 = scmp.lt.s32.totalorder %s883_s13, %s883_s13 }
   0xf   :  { %p890_p8 = por %p889_p7, %p888_p6 }
  0x11   :  { %p891_p9 = pnand %p890_p8, %p884_p5 }
  0x13   :  { %894 = shalt.err (!%p891_p9)  }
  0x14   :  { %s930_s0 = smov [#allocation4]   ;;  %s22_s15 = sshll.u32 %s1177_s2, 4  ;;  %s23_s15 = int_to_ptr.vmem [resolvable:$true] %s22_s15 }
  0x15   :  { %21 = dma.vmem_to_smem %s19_s10, 16, %s930_s0, [#allocation2] }
  0x16   :  { %s26_s18 = sshll.u32 %s1178_s3, 4  ;;  %s895_s19 = scalar_lea.vmem %s23_s15, 16  ;;  %s27_s18 = int_to_ptr.vmem [resolvable:$true] %s26_s18 }
  0x17   :  { %p896_p10 = scmp.ne.s32.totalorder %s23_s15, %s895_s19  ;;  %p900_p11 = scmp.lt.s32.totalorder %s23_s15, %s23_s15 }
  0x18   :  { %p901_p12 = scmp.lt.s32.totalorder %s895_s19, %s895_s19 }
  0x1a   :  { %p902_p13 = por %p901_p12, %p900_p11 }
  0x1c   :  { %p903_p0 = pnand %p902_p13, %p896_p10 }
  0x1e   :  { %906 = shalt.err (!%p903_p0)  }
  0x1f   :  { %s931_s20 = smov [#allocation5]   ;;  %s907_s21 = scalar_lea.vmem %s27_s18, 16 }
  0x20   :  { %25 = dma.vmem_to_smem %s23_s15, 16, %s931_s20, [#allocation2] }
  0x21   :  { %p908_p1 = scmp.ne.s32.totalorder %s27_s18, %s907_s21  ;;  %p912_p2 = scmp.lt.s32.totalorder %s27_s18, %s27_s18 }
  0x22   :  { %p913_p3 = scmp.lt.s32.totalorder %s907_s21, %s907_s21 }
  0x24   :  { %p914_p4 = por %p913_p3, %p912_p2 }
  0x26   :  { %p915_p5 = pnand %p914_p4, %p908_p1 }
  0x28   :  { %918 = shalt.err (!%p915_p5)  }
  0x29   :  { %s932_s2 = smov [#allocation6]  }
  0x2a   :  { %29 = dma.vmem_to_smem %s27_s18, 16, %s932_s2, [#allocation2] }
  0x2b   :  { %923 = dma.done.wait [#allocation2], 64 }
  0x2c   :  { %924 = vsyncadd [#allocation2], 4294967232 }
  0x2d   :  { %31 = sfence }
  0x2e   :  { %s990_s3 = smov 0  }
  0x2f LB: > { %s996_s22 = sadd.s32 4294967295, %s927_s3   ;;  %p767_p6 = scmp.ge.s32.totalorder %s927_s3, 1  ;;  %s927_s3 = sphi %s990_s3, %s37_s3  }
  0x30   : > { %p217_p7 = scmp.lt.s32.totalorder %s927_s3, 36 }
  0x32   : > { %p218_p8 = pnand %p767_p6, %p217_p7 }
  0x33   : > { %s259_s23 = sld [smem:[#allocation3 + %s996_s22]] (!%p218_p8)  ;;  %p266_p9 = scmp.lt.s32.totalorder (!%p218_p8), %s996_s22, 34 }
  0x34   : > { %221 = sbr.rel (%p218_p8) target bundleno = 340 (0x154), region = 32  ;;  %s271_s24 = sld [smem:[#allocation4 + %s996_s22]] (!%p218_p8) }
  0x35   : > { %s276_s26 = sld [smem:[#allocation4 + %s996_s22]] (!%p218_p8) }
  0x36   : > { %s283_s28 = sld [smem:[#allocation4 + %s996_s22]] (!%p218_p8) }
  0x37   : > { %s290_s10 = sld [smem:[#allocation5 + %s996_s22]] (!%p218_p8) }
  0x39   : > { %s267_s25 = scalar_select %p266_p9, %s996_s22, 34 }
  0x3a   : > { %p260_p10 = scmp.lt.s32.totalorder %s259_s23, 24  ;;  %p272_p11 = scmp.lt.s32.totalorder %s271_s24, 2 }
  0x3b   : > { %s801_s27 = sshll.u32 %s267_s25, 5  ;;  %p277_p12 = scmp.lt.s32.totalorder %s276_s26, 2 }
  0x3c   : > { %s1009_s9 = scalar_lea.vmem %s1172_s5, %s801_s27  ;;  %s1180_s23 = smov (!%p260_p10, %s259_s23), 24 }
  0x3d   : > { %s1182_s24 = smov (!%p272_p11, %s271_s24), 2  ;;  %s800_s11 = sshll.u32 %s1180_s23, 6 }
  0x3e   : > { %s1015_s0 = scalar_lea.vmem %s1171_s4, %s800_s11  ;;  %s274_s15 = scalar_lea.vmem %s1173_s6, %s1182_s24 }
  0x3f   : > { %s1184_s26 = smov (!%p277_p12, %s276_s26), 2  ;;  %p284_p13 = scmp.lt.s32.totalorder %s283_s28, 2 }
  0x40   : > { %s802_s16 = sshll.u32 %s1184_s26, 7  ;;  %p775_p0 = scmp.ne.s32.totalorder %s290_s10, 1 }
  0x41   : > { %s1023_s19 = scalar_lea.vmem %s1174_s7, %s802_s16  ;;  %s1186_s28 = smov (!%p284_p13, %s283_s28), 2 }
  0x42   : > { %s774_s20 = sshll.u32 %s1186_s28, 1  ;;  %294 = sbr.rel (%p775_p0) target bundleno = 80 (0x50), region = 36 }
  0x43   : > { %s1028_s23 = scalar_lea.vmem %s1175_s8, %s774_s20 }
  0x47   : > { %v776_v0 = vld [vmem:[%s274_s15] ss:$0 sm:$0xff]  ;;  %vm302_vm0 = vcmask 523264  }
  0x48   : > { %303 = vst.msk [vmem:[%s1023_s19] sm:$0xff] %vm302_vm0, %v776_v0  ;;  %304 = vst.msk [vmem:[%s1023_s19 + $0x8] sm:$0xff] %vm302_vm0, %v776_v0 }
  0x49   : > { %305 = vst.msk [vmem:[%s1023_s19 + $0x10] sm:$0xff] %vm302_vm0, %v776_v0  ;;  %306 = vst.msk [vmem:[%s1023_s19 + $0x18] sm:$0xff] %vm302_vm0, %v776_v0 }
  0x4a   : > { %307 = vst.msk [vmem:[%s1023_s19 + $0x20] sm:$0xff] %vm302_vm0, %v776_v0  ;;  %308 = vst.msk [vmem:[%s1023_s19 + $0x28] sm:$0xff] %vm302_vm0, %v776_v0 }
  0x4b   : > { %309 = vst.msk [vmem:[%s1023_s19 + $0x30] sm:$0xff] %vm302_vm0, %v776_v0  ;;  %310 = vst.msk [vmem:[%s1023_s19 + $0x38] sm:$0xff] %vm302_vm0, %v776_v0 }
  0x4c   : > { %311 = vst.msk [vmem:[%s1023_s19 + $0x40] sm:$0xff] %vm302_vm0, %v776_v0  ;;  %312 = vst.msk [vmem:[%s1023_s19 + $0x48] sm:$0xff] %vm302_vm0, %v776_v0 }
  0x4d   : > { %313 = vst.msk [vmem:[%s1023_s19 + $0x50] sm:$0xff] %vm302_vm0, %v776_v0  ;;  %314 = vst.msk [vmem:[%s1023_s19 + $0x58] sm:$0xff] %vm302_vm0, %v776_v0 }
  0x4e   : > { %315 = vst.msk [vmem:[%s1023_s19 + $0x60] sm:$0xff] %vm302_vm0, %v776_v0  ;;  %316 = vst.msk [vmem:[%s1023_s19 + $0x68] sm:$0xff] %vm302_vm0, %v776_v0 }
  0x4f   : > { %317 = vst.msk [vmem:[%s1023_s19 + $0x70] sm:$0xff] %vm302_vm0, %v776_v0  ;;  %318 = vst.msk [vmem:[%s1023_s19 + $0x78] sm:$0xff] %vm302_vm0, %v776_v0 }
  0x50 PF: > { %v859_v1 = vld [vmem:[%s1009_s9 + $0x18] sm:$0xff]   ;;  %v860_v2 = vld [vmem:[%s1009_s9 + $0x10] sm:$0xff]   ;;  %v861_v3 = vld [vmem:[%s1009_s9 + $0x8] sm:$0xff]   ;;  %vm423_vm1 = vcmask 523264   ;;  %s1083_s24 = sld [smem:[#allocation6 + %s996_s22]] }
  0x51   : > { %815 = vmatprep.subr.bf16.mxu0 %v859_v1  ;;  %839 = vmatprep.subr.bf16.mxu1 %v859_v1  ;;  %v863_v4 = vld [vmem:[%s1015_s0] sm:$0xff]   ;;  %v865_v7 = vld [vmem:[%s1015_s0 + $0x8] sm:$0xff]   ;;  %v867_v9 = vld [vmem:[%s1015_s0 + $0x10] sm:$0xff]  }
  0x52   : > { %816 = vmatpush3.bf16.msra.mxu0 %v859_v1  ;;  %843 = vmatpush3.bf16.msra.mxu1 %v859_v1  ;;  %v864_v5 = vld [vmem:[%s1015_s0 + $0x20] sm:$0xff]   ;;  %v866_v8 = vld [vmem:[%s1015_s0 + $0x28] sm:$0xff]   ;;  %v868_v10 = vld [vmem:[%s1015_s0 + $0x30] sm:$0xff]  }
  0x53   : > { %817 = vmatprep.subr.bf16.mxu0 %v860_v2  ;;  %840 = vmatprep.subr.bf16.mxu1 %v860_v2  ;;  %v862_v6 = vld [vmem:[%s1009_s9] sm:$0xff]   ;;  %v869_v11 = vld [vmem:[%s1015_s0 + $0x18] sm:$0xff]   ;;  %v321_v13 = vld [vmem:[%s1023_s19 + $0x10] sm:$0xff] }
  0x54   : > { %823 = vmatprep.mubr.msk.bf16.mxu0 %vm423_vm1, %v863_v4  ;;  %831 = vmatprep.mubr.msk.bf16.mxu1 %vm423_vm1, %v864_v5  ;;  %v870_v12 = vld [vmem:[%s1015_s0 + $0x38] sm:$0xff]   ;;  %v329_v14 = vld [vmem:[%s1023_s19 + $0x50] sm:$0xff]  ;;  %v319_v17 = vld [vmem:[%s1023_s19] sm:$0xff] }
  0x55   : > { %v327_v18 = vld [vmem:[%s1023_s19 + $0x40] sm:$0xff]  ;;  %v322_v23 = vld [vmem:[%s1023_s19 + $0x18] sm:$0xff]  ;;  %v320_v29 = vld [vmem:[%s1023_s19 + $0x8] sm:$0xff] }
  0x56   : > { %818 = vmatpush3.bf16.msra.mxu0 %v860_v2  ;;  %844 = vmatpush3.bf16.msra.mxu1 %v860_v2  ;;  %v330_v24 = vld [vmem:[%s1023_s19 + $0x58] sm:$0xff]  ;;  %v328_v30 = vld [vmem:[%s1023_s19 + $0x48] sm:$0xff]  ;;  %v325_v35 = vld [vmem:[%s1023_s19 + $0x30] sm:$0xff]  ;;  %p797_p1 = scmp.ne.s32.totalorder %s1083_s24, 1 }
  0x57   : > { %819 = vmatprep.subr.bf16.mxu0 %v861_v3  ;;  %841 = vmatprep.subr.bf16.mxu1 %v861_v3  ;;  %v333_v36 = vld [vmem:[%s1023_s19 + $0x70] sm:$0xff]  ;;  %v323_v41 = vld [vmem:[%s1023_s19 + $0x20] sm:$0xff]  ;;  %v326_v47 = vld [vmem:[%s1023_s19 + $0x38] sm:$0xff] }
  0x58   : > { %v331_v42 = vld [vmem:[%s1023_s19 + $0x60] sm:$0xff]  ;;  %v334_v48 = vld [vmem:[%s1023_s19 + $0x78] sm:$0xff]  ;;  %v324_v53 = vld [vmem:[%s1023_s19 + $0x28] sm:$0xff] }
  0x59   : > { %v332_v54 = vld [vmem:[%s1023_s19 + $0x68] sm:$0xff] }
  0x5a   : > { %820 = vmatpush3.bf16.msra.mxu0 %v861_v3  ;;  %845 = vmatpush3.bf16.msra.mxu1 %v861_v3 }
  0x5b   : > { %821 = vmatprep.subr.bf16.mxu0 %v862_v6  ;;  %842 = vmatprep.subr.bf16.mxu1 %v862_v6 }
  0x5e   : > { %822 = vmatpush3.bf16.msra.mxu0 %v862_v6  ;;  %846 = vmatpush3.bf16.msra.mxu1 %v862_v6 }
  0x61   : > { %824 = vmatmul.mubr.msk.bf16.vlgmr.msra.gmra.mxu0 %vm423_vm1, %v865_v7  ;;  %832 = vmatmul.mubr.msk.bf16.vlgmr.msra.gmra.mxu1 %vm423_vm1, %v866_v8 }
  0x62   : > { %827 = vmatprep.mubr.msk.bf16.mxu0 %vm423_vm1, %v867_v9  ;;  %835 = vmatprep.mubr.msk.bf16.mxu1 %vm423_vm1, %v868_v10 }
  0x69   : > { %828 = vmatmul.mubr.msk.bf16.gmra.mxu0 %vm423_vm1, %v869_v11  ;;  %836 = vmatmul.mubr.msk.bf16.gmra.mxu1 %vm423_vm1, %v870_v12 }
 0x121   : > { %v825_v15 = vpop.f32.mrf.mxu0  ;;  %v833_v16 = vpop.f32.mrf.mxu1 }
 0x122   : > { %v547_v19 = vadd.f32 %v825_v15, %v321_v13  ;;  %v555_v20 = vadd.f32 %v833_v16, %v329_v14 }
 0x123   : > { %v482_v21 = vpop.f32.mrf.mxu0  ;;  %v514_v22 = vpop.f32.mrf.mxu1 }
 0x124   : > { %563 = vst.msk [vmem:[%s1023_s19 + $0x10] sm:$0xff] %vm423_vm1, %v547_v19  ;;  %571 = vst.msk [vmem:[%s1023_s19 + $0x50] sm:$0xff] %vm423_vm1, %v555_v20  ;;  %v545_v25 = vadd.f32 %v482_v21, %v319_v17  ;;  %v553_v26 = vadd.f32 %v514_v22, %v327_v18 }
 0x125   : > { %v826_v27 = vpop.f32.mrf.mxu0  ;;  %v834_v28 = vpop.f32.mrf.mxu1 }
 0x126   : > { %561 = vst.msk [vmem:[%s1023_s19] sm:$0xff] %vm423_vm1, %v545_v25  ;;  %569 = vst.msk [vmem:[%s1023_s19 + $0x40] sm:$0xff] %vm423_vm1, %v553_v26  ;;  %v548_v31 = vadd.f32 %v826_v27, %v322_v23  ;;  %v556_v32 = vadd.f32 %v834_v28, %v330_v24 }
 0x127   : > { %v485_v33 = vpop.f32.mrf.mxu0  ;;  %v517_v34 = vpop.f32.mrf.mxu1 }
 0x128   : > { %564 = vst.msk [vmem:[%s1023_s19 + $0x18] sm:$0xff] %vm423_vm1, %v548_v31  ;;  %572 = vst.msk [vmem:[%s1023_s19 + $0x58] sm:$0xff] %vm423_vm1, %v556_v32  ;;  %v546_v37 = vadd.f32 %v485_v33, %v320_v29  ;;  %v554_v38 = vadd.f32 %v517_v34, %v328_v30 }
 0x129   : > { %v829_v39 = vpop.f32.mrf.mxu0  ;;  %v837_v40 = vpop.f32.mrf.mxu1 }
 0x12a   : > { %562 = vst.msk [vmem:[%s1023_s19 + $0x8] sm:$0xff] %vm423_vm1, %v546_v37  ;;  %570 = vst.msk [vmem:[%s1023_s19 + $0x48] sm:$0xff] %vm423_vm1, %v554_v38  ;;  %v551_v43 = vadd.f32 %v829_v39, %v325_v35  ;;  %v559_v44 = vadd.f32 %v837_v40, %v333_v36 }
 0x12b   : > { %v498_v45 = vpop.f32.mrf.mxu0  ;;  %v530_v46 = vpop.f32.mrf.mxu1 }
 0x12c   : > { %567 = vst.msk [vmem:[%s1023_s19 + $0x30] sm:$0xff] %vm423_vm1, %v551_v43  ;;  %575 = vst.msk [vmem:[%s1023_s19 + $0x70] sm:$0xff] %vm423_vm1, %v559_v44  ;;  %v549_v49 = vadd.f32 %v498_v45, %v323_v41  ;;  %v557_v50 = vadd.f32 %v530_v46, %v331_v42 }
 0x12d   : > { %v830_v51 = vpop.f32.mrf.mxu0  ;;  %v838_v52 = vpop.f32.mrf.mxu1 }
 0x12e   : > { %565 = vst.msk [vmem:[%s1023_s19 + $0x20] sm:$0xff] %vm423_vm1, %v549_v49  ;;  %573 = vst.msk [vmem:[%s1023_s19 + $0x60] sm:$0xff] %vm423_vm1, %v557_v50  ;;  %v552_v55 = vadd.f32 %v830_v51, %v326_v47  ;;  %v560_v56 = vadd.f32 %v838_v52, %v334_v48  ;;  %581 = sbr.rel (%p797_p1) target bundleno = 340 (0x154), region = 40 }
 0x12f   : > { %v501_v57 = vpop.f32.mrf.mxu0  ;;  %v533_v58 = vpop.f32.mrf.mxu1 }
 0x130   : > { %568 = vst.msk [vmem:[%s1023_s19 + $0x38] sm:$0xff] %vm423_vm1, %v552_v55  ;;  %576 = vst.msk [vmem:[%s1023_s19 + $0x78] sm:$0xff] %vm423_vm1, %v560_v56  ;;  %v550_v59 = vadd.f32 %v501_v57, %v324_v53  ;;  %v558_v60 = vadd.f32 %v533_v58, %v332_v54 }
 0x132   : > { %566 = vst.msk [vmem:[%s1023_s19 + $0x28] sm:$0xff] %vm423_vm1, %v550_v59  ;;  %574 = vst.msk [vmem:[%s1023_s19 + $0x68] sm:$0xff] %vm423_vm1, %v558_v60 }
 0x133   : > { %v582_v61 = vld [vmem:[%s1023_s19] sm:$0xff]  ;;  %v583_v62 = vld [vmem:[%s1023_s19 + $0x8] sm:$0xff]  ;;  %v584_v63 = vld [vmem:[%s1023_s19 + $0x10] sm:$0xff]  ;;  %vm645_vm2 = vcmask 1041409   ;;  %vm648_vm3 = vcmask 517120  }
 0x134   : > { %v585_v0 = vld [vmem:[%s1023_s19 + $0x18] sm:$0xff]  ;;  %v598_v1 = vsel %vm423_vm1, %v582_v61, 0.0  ;;  %v599_v2 = vsel %vm423_vm1, %v583_v62, 0.0  ;;  %v601_v3 = vsel %vm423_vm1, %v584_v63, 0.0  ;;  %v590_v5 = vld [vmem:[%s1023_s19 + $0x40] sm:$0xff]  ;;  %v591_v7 = vld [vmem:[%s1023_s19 + $0x48] sm:$0xff] }
 0x135   : > { %v586_v4 = vld [vmem:[%s1023_s19 + $0x20] sm:$0xff]  ;;  %v600_v6 = vadd.f32 %v599_v2, %v598_v1  ;;  %v592_v8 = vld [vmem:[%s1023_s19 + $0x50] sm:$0xff]  ;;  %v593_v9 = vld [vmem:[%s1023_s19 + $0x58] sm:$0xff]  ;;  %v603_v10 = vsel %vm423_vm1, %v585_v0, 0.0  ;;  %v619_v11 = vsel %vm423_vm1, %v590_v5, 0.0  ;;  %v620_v14 = vsel %vm423_vm1, %v591_v7, 0.0 }
 0x136   : > { %v622_v15 = vsel %vm423_vm1, %v592_v8, 0.0  ;;  %v594_v16 = vld [vmem:[%s1023_s19 + $0x60] sm:$0xff]  ;;  %v605_v17 = vsel %vm423_vm1, %v586_v4, 0.0  ;;  %v621_v18 = vadd.f32 %v620_v14, %v619_v11  ;;  %v588_v19 = vld [vmem:[%s1023_s19 + $0x30] sm:$0xff]  ;;  %v624_v21 = vsel %vm423_vm1, %v593_v9, 0.0 }
 0x137   : > { %v602_v13 = vadd.f32 %v601_v3, %v600_v6  ;;  %v589_v25 = vld [vmem:[%s1023_s19 + $0x38] sm:$0xff]  ;;  %v626_v27 = vsel %vm423_vm1, %v594_v16, 0.0  ;;  %v596_v28 = vld [vmem:[%s1023_s19 + $0x70] sm:$0xff]  ;;  %v609_v29 = vsel %vm423_vm1, %v588_v19, 0.0 }
 0x138   : > { %v623_v24 = vadd.f32 %v622_v15, %v621_v18  ;;  %v597_v33 = vld [vmem:[%s1023_s19 + $0x78] sm:$0xff]  ;;  %v611_v34 = vsel %vm423_vm1, %v589_v25, 0.0  ;;  %v630_v37 = vsel %vm423_vm1, %v596_v28, 0.0 }
 0x139   : > { %v587_v12 = vld [vmem:[%s1023_s19 + $0x28] sm:$0xff]  ;;  %v604_v20 = vadd.f32 %v603_v10, %v602_v13  ;;  %v632_v40 = vsel %vm423_vm1, %v597_v33, 0.0 }
 0x13a   : > { %v595_v22 = vld [vmem:[%s1023_s19 + $0x68] sm:$0xff]  ;;  %v607_v23 = vsel %vm423_vm1, %v587_v12, 0.0  ;;  %v625_v30 = vadd.f32 %v624_v21, %v623_v24 }
 0x13b   : > { %v606_v26 = vadd.f32 %v605_v17, %v604_v20  ;;  %v628_v32 = vsel %vm423_vm1, %v595_v22, 0.0 }
 0x13c   : > { %v627_v35 = vadd.f32 %v626_v27, %v625_v30 }
 0x13d   : > { %v608_v31 = vadd.f32 %v607_v23, %v606_v26 }
 0x13e   : > { %v629_v38 = vadd.f32 %v628_v32, %v627_v35 }
 0x13f   : > { %v610_v36 = vadd.f32 %v609_v29, %v608_v31 }
 0x140   : > { %v631_v41 = vadd.f32 %v630_v37, %v629_v38 }
 0x141   : > { %v612_v39 = vadd.f32 %v611_v34, %v610_v36 }
 0x142   : > { %v633_v43 = vadd.f32 %v632_v40, %v631_v41 }
 0x143   : > { %v613_v42 = vrot.slane %v612_v39, 4 }
 0x144   : > { %v634_v45 = vrot.slane %v633_v43, 4 }
 0x145   : > { %v614_v44 = vadd.f32 %v613_v42, %v612_v39 }
 0x146   : > { %v635_v47 = vadd.f32 %v634_v45, %v633_v43 }
 0x147   : > { %v615_v46 = vrot.slane %v614_v44, 2 }
 0x148   : > { %v636_v49 = vrot.slane %v635_v47, 2 }
 0x149   : > { %v616_v48 = vadd.f32 %v615_v46, %v614_v44 }
 0x14a   : > { %v637_v51 = vadd.f32 %v636_v49, %v635_v47 }
 0x14b   : > { %v617_v50 = vrot.slane %v616_v48, 1 }
 0x14c   : > { %v638_v53 = vrot.slane %v637_v51, 1 }
 0x14d   : > { %v618_v52 = vadd.f32 %v617_v50, %v616_v48 }
 0x14e   : > { %v639_v54 = vadd.f32 %v638_v53, %v637_v51 }
 0x14f   : > { %v641_v55 = vmul.f32 0.015625, %v618_v52 }
 0x150   : > { %v642_v56 = vmul.f32 0.015625, %v639_v54 }
 0x152   : > { %v646_v57 = vsel %vm645_vm2, %v642_v56, %v641_v55 }
 0x153   : > { %649 = vst.msk [vmem:[%s1028_s23] sm:$0x3] %vm648_vm3, %v646_v57 }
 0x154 PF: > { %s37_s3 = sadd.s32 1, %s927_s3  }
 0x155   : > { %p34_p2 = scmp.ge.s32.totalorder %s37_s3, 37  }
 0x157   :  { %36 = sbr.rel (!%p34_p2) target bundleno = 47 (0x2f), region = 88 }

// kernel: msffe_forward.4
= control target key start
LH: loop header
LB: loop body
LE: loop exit
PB: predicated region body
PF: predicated region fallthrough
CT: control target
= control target key end

     0   :  { %v591_v0 = vmov 0.0   ;;  %vm592_vm0 = vmmov 0   ;;  %vm61_vm1 = vcmask 523264   ;;  %vm265_vm2 = vcmask 1045504   ;;  %s706_s1 = inlined_call_operand.vmem [shape: bf16[3,64,12], index: 1, kind: input, shape index: {}]   ;;  %s707_s0 = inlined_call_operand.vmem [shape: f32[3,2,64], index: 0, kind: input, shape index: {}]   ;;  %s708_s2 = inlined_call_operand.vmem [shape: bf16[3,12,64], index: 2, kind: input, shape index: {}]   ;;  %s709_s3 = inlined_call_operand.vmem [shape: f32[3,2,64], index: 3, kind: output, shape index: {}]  }
   0x1   :  { %508 = vmatprep.subr.bf16.mxu0 %v591_v0  ;;  %v564_v1 = vld [vmem:[%s706_s1 + $0x38] sm:$0xff]   ;;  %520 = vmatprep.subr.bf16.mxu1 %v591_v0  ;;  %v566_v3 = vld [vmem:[%s706_s1 + $0x30] sm:$0xff]   ;;  %v568_v5 = vld [vmem:[%s706_s1 + $0x28] sm:$0xff]   ;;  %vm261_vm3 = vcmask 97280   ;;  %vm315_vm4 = vcmask 517120  }
   0x2   :  { %v565_v2 = vld [vmem:[%s706_s1 + $0x18] sm:$0xff]   ;;  %516 = vmatprep.mubr.msk.bf16.mxu0 %vm592_vm0, %v591_v0  ;;  %528 = vmatprep.mubr.msk.bf16.mxu1 %vm592_vm0, %v591_v0  ;;  %v567_v4 = vld [vmem:[%s706_s1 + $0x10] sm:$0xff]   ;;  %v569_v6 = vld [vmem:[%s706_s1 + $0x8] sm:$0xff]  }
   0x3   :  { %509 = vmatpush3.bf16.msra.mxu0 %v564_v1  ;;  %521 = vmatpush3.bf16.msra.mxu1 %v565_v2  ;;  %v570_v7 = vld [vmem:[%s706_s1 + $0x20] sm:$0xff]   ;;  %v572_v13 = vld [vmem:[%s706_s1 + $0x58] sm:$0xff]   ;;  %v573_v14 = vld [vmem:[%s706_s1 + $0x50] sm:$0xff]  }
   0x4   :  { %510 = vmatprep.subr.bf16.mxu0 %v591_v0  ;;  %522 = vmatprep.subr.bf16.mxu1 %v591_v0  ;;  %v571_v8 = vld [vmem:[%s706_s1] sm:$0xff]   ;;  %v574_v15 = vld [vmem:[%s706_s1 + $0x48] sm:$0xff]   ;;  %v577_v21 = vld [vmem:[%s708_s2 + $0x10] sm:$0x3f]  }
   0x5   :  { %v439_v9 = vld [vmem:[%s707_s0 + $0x2] sm:$0x3]  ;;  %v15_v10 = vld [vmem:[%s707_s0] sm:$0x3]  ;;  %v458_v17 = vld [vmem:[%s707_s0 + $0x4] sm:$0x3] }
   0x6   :  { %v27_v11 = vpack.c.bf16 %v439_v9, %v439_v9  ;;  %v16_v12 = vpack.c.bf16 %v15_v10, %v15_v10  ;;  %v575_v16 = vld [vmem:[%s706_s1 + $0x40] sm:$0xff]   ;;  %v174_v18 = vpack.c.bf16 %v458_v17, %v458_v17  ;;  %v385_v22 = vsel %vm265_vm2, %v577_v21, 0  ;;  %v578_v23 = vld [vmem:[%s708_s2 + $0x8] sm:$0x3f]  }
   0x7   :  { %511 = vmatpush3.bf16.msra.mxu0 %v566_v3  ;;  %523 = vmatpush3.bf16.msra.mxu1 %v567_v4  ;;  %v576_v19 = vld [vmem:[%s708_s2] sm:$0x3f]   ;;  %v326_v24 = vsel %vm265_vm2, %v578_v23, 0 }
   0x8   :  { %512 = vmatprep.subr.bf16.mxu0 %v591_v0  ;;  %524 = vmatprep.subr.bf16.mxu1 %v591_v0  ;;  %v267_v20 = vsel %vm265_vm2, %v576_v19, 0 }
   0xb   :  { %513 = vmatpush3.bf16.msra.mxu0 %v568_v5  ;;  %525 = vmatpush3.bf16.msra.mxu1 %v569_v6 }
   0xc   :  { %514 = vmatprep.subr.bf16.mxu0 %v591_v0  ;;  %526 = vmatprep.subr.bf16.mxu1 %v591_v0 }
   0xf   :  { %515 = vmatpush3.bf16.msra.mxu0 %v570_v7  ;;  %527 = vmatpush3.bf16.msra.mxu1 %v571_v8 }
  0x10   :  { %532 = vmatprep.subr.bf16.mxu0 %v591_v0  ;;  %544 = vmatprep.subr.bf16.mxu1 %v591_v0 }
  0x12   :  { %517 = vmatmul.mubr.msk.bf16.vlgmr.msra.gmra.mxu0 %vm61_vm1, %v27_v11  ;;  %529 = vmatmul.mubr.msk.bf16.vlgmr.msra.gmra.mxu1 %vm61_vm1, %v16_v12 }
  0x13   :  { %533 = vmatpush3.bf16.msra.mxu0 %v572_v13  ;;  %540 = vmatprep.mubr.msk.bf16.mxu0 %vm592_vm0, %v591_v0 }
  0x14   :  { %534 = vmatprep.subr.bf16.mxu0 %v591_v0  ;;  %546 = vmatprep.mubr.msk.bf16.mxu1 %vm592_vm0, %v591_v0 }
  0x15   :  { %545 = vmatpush3.bf16.msra.mxu1 %v267_v20 }
  0x16   :  { %550 = vmatprep.subr.bf16.mxu1 %v591_v0 }
  0x17   :  { %535 = vmatpush3.bf16.msra.mxu0 %v573_v14 }
  0x18   :  { %536 = vmatprep.subr.bf16.mxu0 %v591_v0 }
  0x1b   :  { %537 = vmatpush3.bf16.msra.mxu0 %v574_v15 }
  0x1c   :  { %538 = vmatprep.subr.bf16.mxu0 %v591_v0 }
  0x1f   :  { %539 = vmatpush3.bf16.msra.mxu0 %v575_v16 }
  0x20   :  { %556 = vmatprep.subr.bf16.mxu0 %v591_v0 }
  0x22   :  { %541 = vmatmul.mubr.msk.bf16.vlgmr.msra.gmra.mxu0 %vm61_vm1, %v174_v18 }
  0x23   :  { %558 = vmatprep.mubr.msk.bf16.mxu0 %vm592_vm0, %v591_v0  ;;  %557 = vmatpush3.bf16.msra.mxu0 %v385_v22 }
  0xd2   :  { %v99_v25 = vpop.f32.mrf.mxu0  ;;  %v166_v26 = vpop.f32.mrf.mxu1 }
  0xd3   :  { %v167_v33 = vadd.f32 %v166_v26, %v99_v25 }
  0xd4   :  { %v518_v27 = vpop.f32.mrf.mxu0  ;;  %v530_v28 = vpop.f32.mrf.mxu1 }
  0xd6   :  { %v102_v29 = vpop.f32.mrf.mxu0  ;;  %v169_v30 = vpop.f32.mrf.mxu1 }
  0xd8   :  { %v519_v31 = vpop.f32.mrf.mxu0  ;;  %v531_v32 = vpop.f32.mrf.mxu1 }
  0xe2   :  { %v245_v34 = vpop.f32.mrf.mxu0 }
  0xe3   :  { %v251_v35 = vadd.f32 %v245_v34, %v167_v33 }
  0xe4   :  { %v542_v36 = vpop.f32.mrf.mxu0 }
  0xe5   :  { %v252_v37 = vmax.f32 %v251_v35, 0.0 }
  0xe6   :  { %v248_v38 = vpop.f32.mrf.mxu0 }
  0xe7   :  { %v253_v39 = vpack.c.bf16 %v252_v37, %v252_v37 }
  0xe8   :  { %v543_v40 = vpop.f32.mrf.mxu0 }
  0xe9   :  { %547 = vmatmul.mubr.msk.bf16.vlgmr.msra.gmra.mxu1 %vm261_vm3, %v253_v39  ;;  %559 = vmatmul.mubr.msk.bf16.vlgmr.msra.gmra.mxu0 %vm261_vm3, %v253_v39 }
  0xea   :  { %551 = vmatpush3.bf16.msra.mxu1 %v326_v24  ;;  %552 = vmatprep.mubr.msk.bf16.mxu1 %vm592_vm0, %v591_v0 }
  0xf1   :  { %553 = vmatmul.mubr.msk.bf16.vlgmr.msra.gmra.mxu1 %vm261_vm3, %v253_v39 }
 0x1a9   :  { %v303_v41 = vpop.f32.mrf.mxu1  ;;  %v421_v42 = vpop.f32.mrf.mxu0 }
 0x1aa   :  { %v474_v43 = vmul.f32 -1.442695, %v303_v41  ;;  %v485_v44 = vmul.f32 -1.442695, %v421_v42 }
 0x1ab   :  { %v548_v45 = vpop.f32.mrf.mxu1  ;;  %v560_v46 = vpop.f32.mrf.mxu0 }
 0x1ac   :  { %579 = vpow2.f32 %v474_v43 }
 0x1ad   :  { %581 = vpow2.f32 %v485_v44  ;;  %v306_v47 = vpop.f32.mrf.mxu1  ;;  %v424_v48 = vpop.f32.mrf.mxu0 }
 0x1af   :  { %v549_v49 = vpop.f32.mrf.mxu1  ;;  %v561_v50 = vpop.f32.mrf.mxu0 }
 0x1b1   :  { %v362_v51 = vpop.f32.mrf.mxu1 }
 0x1b2   :  { %v479_v52 = vmul.f32 -1.442695, %v362_v51 }
 0x1b3   :  { %v554_v53 = vpop.f32.mrf.mxu1 }
 0x1b4   :  { %583 = vpow2.f32 %v479_v52 }
 0x1b5   :  { %v365_v54 = vpop.f32.mrf.mxu1 }
 0x1b7   :  { %v555_v55 = vpop.f32.mrf.mxu1 }
 0x1b9   :  { %v580_v56 = vpop.eup %579 }
 0x1ba   :  { %v582_v57 = vpop.eup %581  ;;  %v312_v58 = vadd.f32 1.0, %v580_v56 }
 0x1bb   :  { %v430_v59 = vadd.f32 1.0, %v582_v57 }
 0x1bc   :  { %585 = vrcp.f32 %v312_v58 }
 0x1bd   :  { %587 = vrcp.f32 %v430_v59 }
 0x1c1   :  { %v584_v60 = vpop.eup %583 }
 0x1c2   :  { %v371_v61 = vadd.f32 1.0, %v584_v60 }
 0x1c4   :  { %589 = vrcp.f32 %v371_v61 }
 0x1c9   :  { %v586_v62 = vpop.eup %585 }
 0x1ca   :  { %v588_v63 = vpop.eup %587  ;;  %316 = vst.msk [vmem:[%s709_s3] sm:$0x3] %vm315_vm4, %v586_v62 }
 0x1cb   :  { %486 = vst.msk [vmem:[%s709_s3 + $0x4] sm:$0x3] %vm315_vm4, %v588_v63 }
 0x1d1   :  { %v590_v0 = vpop.eup %589 }
 0x1d2   :  { %480 = vst.msk [vmem:[%s709_s3 + $0x2] sm:$0x3] %vm315_vm4, %v590_v0 }

// kernel: msffe_forward.5
= control target key start
LH: loop header
LB: loop body
LE: loop exit
PB: predicated region body
PF: predicated region fallthrough
CT: control target
= control target key end

     0   :  { %9 = vsyncpa [#allocation3], 0  ;;  %s812_s15 = smov 0   ;;  %s936_s0 = inlined_call_operand.vmem [shape: f32[3,128,64], index: 0, kind: input, shape index: {}]   ;;  %s937_s1 = inlined_call_operand.vmem [shape: f32[3,2,64], index: 1, kind: input, shape index: {}]   ;;  %s938_s2 = inlined_call_operand.vmem [shape: bf16[3,64,64], index: 2, kind: input, shape index: {}]   ;;  %s939_s3 = inlined_call_operand.vmem [shape: f32[1,64], index: 3, kind: input, shape index: {}]   ;;  %s940_s4 = inlined_call_operand.hbm [shape: f32[128,64], index: 4, kind: output, shape index: {}]  }
   0x1 LB: > { %s818_s16 = sadd.s32 4294967295, %s781_s15   ;;  %p653_p0 = scmp.ge.s32.totalorder %s781_s15, 1  ;;  %s781_s15 = sphi %s812_s15, %s15_s15  }
   0x2   : > { %p177_p1 = scmp.lt.s32.totalorder %s781_s15, 4 }
   0x4   : > { %p178_p2 = pnand %p653_p0, %p177_p1 }
   0x5   : > { %p207_p3 = scmp.lt.s32.totalorder (!%p178_p2), %s818_s16, 2  ;;  %p659_p4 = scmp.ne.s32.totalorder (!%p178_p2), %s818_s16, 0 }
   0x6   : > { %181 = sbr.rel (%p178_p2) target bundleno = 280 (0x118), region = 36 }
   0xb   : > { %s208_s17 = scalar_select %p207_p3, %s818_s16, 2 }
   0xc   : > { %225 = sbr.rel (%p659_p4) target bundleno = 26 (0x1a), region = 40 }
   0xd   : > { %s679_s18 = sshll.u32 %s208_s17, 7  ;;  %s656_s19 = sshll.u32 %s208_s17, 1 }
   0xe   : > { %s827_s22 = scalar_lea.vmem %s936_s0, %s679_s18  ;;  %s832_s25 = scalar_lea.vmem %s937_s1, %s656_s19 }
   0xf   : > { %s680_s26 = sshll.u32 %s208_s17, 5 }
  0x10   : > { %s837_s29 = scalar_lea.vmem %s938_s2, %s680_s26 }
  0x11   : > { %v660_v0 = vld [vmem:[%s939_s3] ss:$0 sm:$0xff]  ;;  %vm233_vm0 = vcmask 523264  }
  0x12   : > { %234 = vst.msk [vmem:[#allocation2] sm:$0xff] %vm233_vm0, %v660_v0  ;;  %235 = vst.msk [vmem:[#allocation2 + $0x8] sm:$0xff] %vm233_vm0, %v660_v0 }
  0x13   : > { %236 = vst.msk [vmem:[#allocation2 + $0x10] sm:$0xff] %vm233_vm0, %v660_v0  ;;  %237 = vst.msk [vmem:[#allocation2 + $0x18] sm:$0xff] %vm233_vm0, %v660_v0 }
  0x14   : > { %238 = vst.msk [vmem:[#allocation2 + $0x20] sm:$0xff] %vm233_vm0, %v660_v0  ;;  %239 = vst.msk [vmem:[#allocation2 + $0x28] sm:$0xff] %vm233_vm0, %v660_v0 }
  0x15   : > { %240 = vst.msk [vmem:[#allocation2 + $0x30] sm:$0xff] %vm233_vm0, %v660_v0  ;;  %241 = vst.msk [vmem:[#allocation2 + $0x38] sm:$0xff] %vm233_vm0, %v660_v0 }
  0x16   : > { %242 = vst.msk [vmem:[#allocation2 + $0x40] sm:$0xff] %vm233_vm0, %v660_v0  ;;  %243 = vst.msk [vmem:[#allocation2 + $0x48] sm:$0xff] %vm233_vm0, %v660_v0 }
  0x17   : > { %244 = vst.msk [vmem:[#allocation2 + $0x50] sm:$0xff] %vm233_vm0, %v660_v0  ;;  %245 = vst.msk [vmem:[#allocation2 + $0x58] sm:$0xff] %vm233_vm0, %v660_v0 }
  0x18   : > { %246 = vst.msk [vmem:[#allocation2 + $0x60] sm:$0xff] %vm233_vm0, %v660_v0  ;;  %247 = vst.msk [vmem:[#allocation2 + $0x68] sm:$0xff] %vm233_vm0, %v660_v0 }
  0x19   : > { %248 = vst.msk [vmem:[#allocation2 + $0x70] sm:$0xff] %vm233_vm0, %v660_v0  ;;  %249 = vst.msk [vmem:[#allocation2 + $0x78] sm:$0xff] %vm233_vm0, %v660_v0 }
  0x1a PF: > { %v743_v1 = vld [vmem:[%s837_s29 + $0x18] sm:$0xff]   ;;  %v744_v2 = vld [vmem:[%s837_s29 + $0x10] sm:$0xff]   ;;  %v279_v3 = vlaneseq  ;;  %v745_v4 = vld [vmem:[%s837_s29 + $0x8] sm:$0xff]   ;;  %v783_v6 = vmov 1966171168   ;;  %vm372_vm1 = vcmask 523264  }
  0x1b   : > { %693 = vmatprep.subr.bf16.mxu0 %v743_v1  ;;  %717 = vmatprep.subr.bf16.mxu1 %v743_v1  ;;  %v661_v5 = vld.sshfl [vmem:[%s832_s25] sm:$0x11 pattern:$0x75316420]  ;;  %v277_v7 = vunpack.c.l.s4 %v783_v6  ;;  %v251_v15 = vld [vmem:[%s827_s22 + $0x8] sm:$0xff]  ;;  %v252_v20 = vld [vmem:[%s827_s22 + $0x10] sm:$0xff] }
  0x1c   : > { %694 = vmatpush3.bf16.msra.mxu0 %v743_v1  ;;  %721 = vmatpush3.bf16.msra.mxu1 %v743_v1  ;;  %v280_v8 = vshrl.u32 %v279_v3, 7  ;;  %v746_v9 = vld [vmem:[%s837_s29] sm:$0xff]   ;;  %v275_v11 = vcombine.high %v661_v5, %v661_v5  ;;  %v259_v19 = vld [vmem:[%s827_s22 + $0x48] sm:$0xff]  ;;  %v253_v23 = vld [vmem:[%s827_s22 + $0x18] sm:$0xff]  ;;  %p674_p5 = scmp.ne.s32.totalorder %s818_s16, 2 }
  0x1d   : > { %695 = vmatprep.subr.bf16.mxu0 %v744_v2  ;;  %718 = vmatprep.subr.bf16.mxu1 %v744_v2  ;;  %v278_v10 = vunpack.c.0.s8 %v277_v7  ;;  %v250_v14 = vld [vmem:[%s827_s22] sm:$0xff]  ;;  %v260_v24 = vld [vmem:[%s827_s22 + $0x50] sm:$0xff]  ;;  %v261_v25 = vld [vmem:[%s827_s22 + $0x58] sm:$0xff] }
  0x1e   : > { %v292_v13 = vsub.s32 0, %v280_v8  ;;  %v258_v18 = vld [vmem:[%s827_s22 + $0x40] sm:$0xff]  ;;  %v255_v27 = vld [vmem:[%s827_s22 + $0x28] sm:$0xff]  ;;  %v256_v38 = vld [vmem:[%s827_s22 + $0x30] sm:$0xff] }
  0x1f   : > { %v281_v12 = vsub.s32 %v278_v10, %v280_v8  ;;  %v254_v26 = vld [vmem:[%s827_s22 + $0x20] sm:$0xff]  ;;  %v263_v33 = vld [vmem:[%s827_s22 + $0x68] sm:$0xff]  ;;  %v257_v39 = vld [vmem:[%s827_s22 + $0x38] sm:$0xff] }
  0x20   : > { %696 = vmatpush3.bf16.msra.mxu0 %v744_v2  ;;  %722 = vmatpush3.bf16.msra.mxu1 %v744_v2  ;;  %v262_v32 = vld [vmem:[%s827_s22 + $0x60] sm:$0xff]  ;;  %v264_v44 = vld [vmem:[%s827_s22 + $0x70] sm:$0xff]  ;;  %v265_v45 = vld [vmem:[%s827_s22 + $0x78] sm:$0xff] }
  0x21   : > { %697 = vmatprep.subr.bf16.mxu0 %v745_v4  ;;  %719 = vmatprep.subr.bf16.mxu1 %v745_v4  ;;  %v282_v16 = vrot.slane %v661_v5, %v281_v12  ;;  %v289_v17 = vrot.slane %v275_v11, %v281_v12  ;;  %v326_v58 = vld [vmem:[#allocation2 + $0x10] sm:$0xff]  ;;  %v324_v62 = vld [vmem:[#allocation2] sm:$0xff]  ;;  %v335_v5 = vld [vmem:[#allocation2 + $0x58] sm:$0xff] }
  0x22   : > { %v334_v59 = vld [vmem:[#allocation2 + $0x50] sm:$0xff]  ;;  %v332_v63 = vld [vmem:[#allocation2 + $0x40] sm:$0xff]  ;;  %v325_v10 = vld [vmem:[#allocation2 + $0x8] sm:$0xff] }
  0x23   : > { %v293_v21 = vrot.slane %v282_v16, %v292_v13  ;;  %v297_v22 = vrot.slane %v289_v17, %v292_v13  ;;  %v333_v11 = vld [vmem:[#allocation2 + $0x48] sm:$0xff]  ;;  %v330_v16 = vld [vmem:[#allocation2 + $0x30] sm:$0xff] }
  0x24   : > { %698 = vmatpush3.bf16.msra.mxu0 %v745_v4  ;;  %723 = vmatpush3.bf16.msra.mxu1 %v745_v4  ;;  %v327_v4 = vld [vmem:[#allocation2 + $0x18] sm:$0xff]  ;;  %v338_v17 = vld [vmem:[#allocation2 + $0x70] sm:$0xff] }
  0x25   : > { %699 = vmatprep.subr.bf16.mxu0 %v746_v9  ;;  %720 = vmatprep.subr.bf16.mxu1 %v746_v9  ;;  %v300_v28 = vmul.f32 %v293_v21, %v250_v14  ;;  %v301_v29 = vmul.f32 %v293_v21, %v251_v15  ;;  %v308_v30 = vmul.f32 %v297_v22, %v258_v18 }
  0x26   : > { %v309_v31 = vmul.f32 %v297_v22, %v259_v19  ;;  %v302_v34 = vmul.f32 %v293_v21, %v252_v20  ;;  %v303_v35 = vmul.f32 %v293_v21, %v253_v23  ;;  %v310_v36 = vmul.f32 %v297_v22, %v260_v24  ;;  %v336_v23 = vld [vmem:[#allocation2 + $0x60] sm:$0xff] }
  0x27   : > { %v311_v37 = vmul.f32 %v297_v22, %v261_v25  ;;  %v316_v40 = vpack.c.bf16 %v301_v29, %v300_v28  ;;  %v304_v42 = vmul.f32 %v293_v21, %v254_v26  ;;  %v305_v43 = vmul.f32 %v293_v21, %v255_v27  ;;  %v331_v28 = vld [vmem:[#allocation2 + $0x38] sm:$0xff] }
  0x28   : > { %700 = vmatpush3.bf16.msra.mxu0 %v746_v9  ;;  %724 = vmatpush3.bf16.msra.mxu1 %v746_v9  ;;  %v320_v41 = vpack.c.bf16 %v309_v31, %v308_v30  ;;  %v317_v46 = vpack.c.bf16 %v303_v35, %v302_v34  ;;  %v312_v48 = vmul.f32 %v297_v22, %v262_v32  ;;  %v339_v29 = vld [vmem:[#allocation2 + $0x78] sm:$0xff]  ;;  %v329_v34 = vld [vmem:[#allocation2 + $0x28] sm:$0xff] }
  0x29   : > { %v321_v47 = vpack.c.bf16 %v311_v37, %v310_v36  ;;  %v313_v49 = vmul.f32 %v297_v22, %v263_v33  ;;  %701 = vmatprep.mubr.msk.bf16.mxu0 %vm372_vm1, %v316_v40  ;;  %v318_v50 = vpack.c.bf16 %v305_v43, %v304_v42  ;;  %v306_v51 = vmul.f32 %v293_v21, %v256_v38  ;;  %v337_v35 = vld [vmem:[#allocation2 + $0x68] sm:$0xff] }
  0x2a   : > { %709 = vmatprep.mubr.msk.bf16.mxu1 %vm372_vm1, %v320_v41  ;;  %v307_v52 = vmul.f32 %v293_v21, %v257_v39  ;;  %v314_v54 = vmul.f32 %v297_v22, %v264_v44  ;;  %v315_v55 = vmul.f32 %v297_v22, %v265_v45  ;;  %v328_v22 = vld [vmem:[#allocation2 + $0x20] sm:$0xff] }
  0x2b   : > { %702 = vmatmul.mubr.msk.bf16.vlgmr.msra.gmra.mxu0 %vm372_vm1, %v317_v46  ;;  %710 = vmatmul.mubr.msk.bf16.vlgmr.msra.gmra.mxu1 %vm372_vm1, %v321_v47  ;;  %v322_v53 = vpack.c.bf16 %v313_v49, %v312_v48 }
  0x2c   : > { %705 = vmatprep.mubr.msk.bf16.mxu0 %vm372_vm1, %v318_v50  ;;  %v319_v56 = vpack.c.bf16 %v307_v52, %v306_v51  ;;  %v323_v57 = vpack.c.bf16 %v315_v55, %v314_v54 }
  0x2d   : > { %713 = vmatprep.mubr.msk.bf16.mxu1 %vm372_vm1, %v322_v53 }
  0x33   : > { %706 = vmatmul.mubr.msk.bf16.gmra.mxu0 %vm372_vm1, %v319_v56  ;;  %714 = vmatmul.mubr.msk.bf16.gmra.mxu1 %vm372_vm1, %v323_v57 }
  0xeb   : > { %v703_v60 = vpop.f32.mrf.mxu0  ;;  %v711_v61 = vpop.f32.mrf.mxu1 }
  0xec   : > { %v496_v0 = vadd.f32 %v703_v60, %v326_v58  ;;  %v504_v1 = vadd.f32 %v711_v61, %v334_v59 }
  0xed   : > { %v431_v2 = vpop.f32.mrf.mxu0  ;;  %v463_v3 = vpop.f32.mrf.mxu1 }
  0xee   : > { %512 = vst.msk [vmem:[#allocation2 + $0x10] sm:$0xff] %vm372_vm1, %v496_v0  ;;  %520 = vst.msk [vmem:[#allocation2 + $0x50] sm:$0xff] %vm372_vm1, %v504_v1  ;;  %v494_v6 = vadd.f32 %v431_v2, %v324_v62  ;;  %v502_v7 = vadd.f32 %v463_v3, %v332_v63 }
  0xef   : > { %v704_v8 = vpop.f32.mrf.mxu0  ;;  %v712_v9 = vpop.f32.mrf.mxu1 }
  0xf0   : > { %510 = vst.msk [vmem:[#allocation2] sm:$0xff] %vm372_vm1, %v494_v6  ;;  %518 = vst.msk [vmem:[#allocation2 + $0x40] sm:$0xff] %vm372_vm1, %v502_v7  ;;  %v497_v12 = vadd.f32 %v704_v8, %v327_v4  ;;  %v505_v13 = vadd.f32 %v712_v9, %v335_v5 }
  0xf1   : > { %v434_v14 = vpop.f32.mrf.mxu0  ;;  %v466_v15 = vpop.f32.mrf.mxu1 }
  0xf2   : > { %513 = vst.msk [vmem:[#allocation2 + $0x18] sm:$0xff] %vm372_vm1, %v497_v12  ;;  %521 = vst.msk [vmem:[#allocation2 + $0x58] sm:$0xff] %vm372_vm1, %v505_v13  ;;  %v495_v18 = vadd.f32 %v434_v14, %v325_v10  ;;  %v503_v19 = vadd.f32 %v466_v15, %v333_v11 }
  0xf3   : > { %v707_v20 = vpop.f32.mrf.mxu0  ;;  %v715_v21 = vpop.f32.mrf.mxu1 }
  0xf4   : > { %511 = vst.msk [vmem:[#allocation2 + $0x8] sm:$0xff] %vm372_vm1, %v495_v18  ;;  %519 = vst.msk [vmem:[#allocation2 + $0x48] sm:$0xff] %vm372_vm1, %v503_v19  ;;  %v500_v24 = vadd.f32 %v707_v20, %v330_v16  ;;  %v508_v25 = vadd.f32 %v715_v21, %v338_v17 }
  0xf5   : > { %v447_v26 = vpop.f32.mrf.mxu0  ;;  %v479_v27 = vpop.f32.mrf.mxu1 }
  0xf6   : > { %516 = vst.msk [vmem:[#allocation2 + $0x30] sm:$0xff] %vm372_vm1, %v500_v24  ;;  %524 = vst.msk [vmem:[#allocation2 + $0x70] sm:$0xff] %vm372_vm1, %v508_v25  ;;  %v498_v30 = vadd.f32 %v447_v26, %v328_v22  ;;  %v506_v31 = vadd.f32 %v479_v27, %v336_v23 }
  0xf7   : > { %v708_v32 = vpop.f32.mrf.mxu0  ;;  %v716_v33 = vpop.f32.mrf.mxu1 }
  0xf8   : > { %514 = vst.msk [vmem:[#allocation2 + $0x20] sm:$0xff] %vm372_vm1, %v498_v30  ;;  %522 = vst.msk [vmem:[#allocation2 + $0x60] sm:$0xff] %vm372_vm1, %v506_v31  ;;  %v501_v36 = vadd.f32 %v708_v32, %v331_v28  ;;  %v509_v37 = vadd.f32 %v716_v33, %v339_v29  ;;  %529 = sbr.rel (%p674_p5) target bundleno = 264 (0x108), region = 44 }
  0xf9   : > { %v450_v38 = vpop.f32.mrf.mxu0  ;;  %v482_v39 = vpop.f32.mrf.mxu1 }
  0xfa   : > { %517 = vst.msk [vmem:[#allocation2 + $0x38] sm:$0xff] %vm372_vm1, %v501_v36  ;;  %525 = vst.msk [vmem:[#allocation2 + $0x78] sm:$0xff] %vm372_vm1, %v509_v37  ;;  %v499_v40 = vadd.f32 %v450_v38, %v329_v34  ;;  %v507_v41 = vadd.f32 %v482_v39, %v337_v35 }
  0xfc   : > { %515 = vst.msk [vmem:[#allocation2 + $0x28] sm:$0xff] %vm372_vm1, %v499_v40  ;;  %523 = vst.msk [vmem:[#allocation2 + $0x68] sm:$0xff] %vm372_vm1, %v507_v41 }
  0xfd   : > { %v530_v42 = vld [vmem:[#allocation2] sm:$0xff]  ;;  %v531_v43 = vld [vmem:[#allocation2 + $0x8] sm:$0xff]  ;;  %v532_v44 = vld [vmem:[#allocation2 + $0x10] sm:$0xff] }
  0xfe   : > { %v546_v45 = vmax.f32 %v530_v42, 0.0  ;;  %v547_v46 = vmax.f32 %v531_v43, 0.0  ;;  %v548_v47 = vmax.f32 %v532_v44, 0.0  ;;  %v533_v48 = vld [vmem:[#allocation2 + $0x18] sm:$0xff]  ;;  %v536_v54 = vld [vmem:[#allocation2 + $0x30] sm:$0xff]  ;;  %v538_v56 = vld [vmem:[#allocation2 + $0x40] sm:$0xff] }
  0xff   : > { %v534_v49 = vld [vmem:[#allocation2 + $0x20] sm:$0xff]  ;;  %v549_v51 = vmax.f32 %v533_v48, 0.0  ;;  %v552_v57 = vmax.f32 %v536_v54, 0.0  ;;  %v554_v59 = vmax.f32 %v538_v56, 0.0  ;;  %v539_v60 = vld [vmem:[#allocation2 + $0x48] sm:$0xff]  ;;  %v540_v61 = vld [vmem:[#allocation2 + $0x50] sm:$0xff] }
 0x100   : > { %v550_v52 = vmax.f32 %v534_v49, 0.0  ;;  %562 = vst.msk [vmem:[#allocation2] sm:$0xff] %vm372_vm1, %v546_v45  ;;  %563 = vst.msk [vmem:[#allocation2 + $0x8] sm:$0xff] %vm372_vm1, %v547_v46  ;;  %v541_v62 = vld [vmem:[#allocation2 + $0x58] sm:$0xff]  ;;  %v555_v63 = vmax.f32 %v539_v60, 0.0  ;;  %v556_v0 = vmax.f32 %v540_v61, 0.0 }
 0x101   : > { %v537_v55 = vld [vmem:[#allocation2 + $0x38] sm:$0xff]  ;;  %564 = vst.msk [vmem:[#allocation2 + $0x10] sm:$0xff] %vm372_vm1, %v548_v47  ;;  %565 = vst.msk [vmem:[#allocation2 + $0x18] sm:$0xff] %vm372_vm1, %v549_v51  ;;  %v557_v1 = vmax.f32 %v541_v62, 0.0  ;;  %v542_v2 = vld [vmem:[#allocation2 + $0x60] sm:$0xff] }
 0x102   : > { %v553_v58 = vmax.f32 %v537_v55, 0.0  ;;  %566 = vst.msk [vmem:[#allocation2 + $0x20] sm:$0xff] %vm372_vm1, %v550_v52  ;;  %v544_v4 = vld [vmem:[#allocation2 + $0x70] sm:$0xff]  ;;  %568 = vst.msk [vmem:[#allocation2 + $0x30] sm:$0xff] %vm372_vm1, %v552_v57  ;;  %v558_v5 = vmax.f32 %v542_v2, 0.0  ;;  %v545_v8 = vld [vmem:[#allocation2 + $0x78] sm:$0xff] }
 0x103   : > { %v535_v50 = vld [vmem:[#allocation2 + $0x28] sm:$0xff]  ;;  %570 = vst.msk [vmem:[#allocation2 + $0x40] sm:$0xff] %vm372_vm1, %v554_v59  ;;  %v560_v7 = vmax.f32 %v544_v4, 0.0  ;;  %571 = vst.msk [vmem:[#allocation2 + $0x48] sm:$0xff] %vm372_vm1, %v555_v63  ;;  %v561_v9 = vmax.f32 %v545_v8, 0.0 }
 0x104   : > { %v551_v53 = vmax.f32 %v535_v50, 0.0  ;;  %v543_v3 = vld [vmem:[#allocation2 + $0x68] sm:$0xff]  ;;  %569 = vst.msk [vmem:[#allocation2 + $0x38] sm:$0xff] %vm372_vm1, %v553_v58  ;;  %572 = vst.msk [vmem:[#allocation2 + $0x50] sm:$0xff] %vm372_vm1, %v556_v0 }
 0x105   : > { %v559_v6 = vmax.f32 %v543_v3, 0.0  ;;  %573 = vst.msk [vmem:[#allocation2 + $0x58] sm:$0xff] %vm372_vm1, %v557_v1  ;;  %574 = vst.msk [vmem:[#allocation2 + $0x60] sm:$0xff] %vm372_vm1, %v558_v5 }
 0x106   : > { %567 = vst.msk [vmem:[#allocation2 + $0x28] sm:$0xff] %vm372_vm1, %v551_v53  ;;  %576 = vst.msk [vmem:[#allocation2 + $0x70] sm:$0xff] %vm372_vm1, %v560_v7 }
 0x107   : > { %575 = vst.msk [vmem:[#allocation2 + $0x68] sm:$0xff] %vm372_vm1, %v559_v6  ;;  %577 = vst.msk [vmem:[#allocation2 + $0x78] sm:$0xff] %vm372_vm1, %v561_v9 }
 0x108 PF: > { %p729_p6 = scmp.eq.s32.totalorder %s818_s16, 2  ;;  %s784_s6 = smov [#allocation2]  }
 0x109   : > { %s584_s7 = sshll.u32 %s784_s6, 4  ;;  %s585_s7 = int_to_ptr.vmem [resolvable:$true] %s584_s7 }
 0x10a   : > { %s747_s8 = scalar_lea.vmem %s585_s7, 2048  ;;  %p754_p10 = scmp.lt.s32.totalorder %s585_s7, %s585_s7 }
 0x10b   : > { %p748_p7 = scmp.ne.s32.totalorder %s585_s7, %s747_s8  ;;  %p755_p11 = scmp.lt.s32.totalorder %s747_s8, %s747_s8 }
 0x10d   : > { %p749_p8 = pnand %p748_p7, %p729_p6  ;;  %p756_p12 = por %p755_p11, %p754_p10 }
 0x10f   : > { %p750_p9 = pneg %p749_p8 }
 0x111   : > { %p757_p13 = pnand %p756_p12, %p750_p9 }
 0x113   : > { %760 = shalt.err (!%p757_p13)
}
 0x114   : > { %s785_s9 = smov 128   ;;  %s786_s10 = smov 8  }
 0x115   : > { %726 = dma.vmem_to_hbm [thread:$0]  (%p729_p6), %s585_s7, 2048, %s940_s4, [#allocation3], %s785_s9, %s785_s9, %s786_s10  }
 0x116   : > { %776 = dma.done.wait (%p729_p6), [#allocation3], 2048  }
 0x117   : > { %778 = vsyncadd (%p729_p6), [#allocation3], 4294965248 }
 0x118 PF: > { %s15_s15 = sadd.s32 1, %s781_s15  }
 0x119   : > { %p12_p0 = scmp.ge.s32.totalorder %s15_s15, 5  }
 0x11b   :  { %14 = sbr.rel (!%p12_p0) target bundleno = 1 (0x1), region = 77 }
 0x120   :  { %600 = vsyncpa [#allocation3], 1 }
 0x121   :  { %602 = vsyncpa [#allocation3 + $0x1], 1 }

</bundles_post_ra>
